<compile_context>
chip_gen: v7x
topology: tpu7x:2x2x1
jax: 0.10.0
libtpu: 0.0.40
codegen_flags: <defaults>
</compile_context>

<pallas_src>
import functools

import jax
import jax.numpy as jnp
from jax.experimental import pallas as pl
from jax.experimental.pallas import tpu as pltpu

_LANE = 128                       # pad K / Cout to multiples of the lane width
_SUB = 8                          # sublane width
_TM = 256                         # row tile (multiple of 256 feeds v6e/v7x MXU)
_VMEM_LIMIT = 32 * 1024 * 1024    # explicit scoped-VMEM budget (v7x-safe)


def _round_up(x, m):
    return ((x + m - 1) // m) * m


# ---------------------------------------------------------------------------
# Kernels
# ---------------------------------------------------------------------------
def _conv_act_kernel(p_ref, w_ref, o_ref, *, act):
    """Fused (M-tile) GEMM + activation for layers without BatchNorm."""
    y = jnp.dot(p_ref[...], w_ref[...], preferred_element_type=jnp.float32)
    if act == "lrelu":
        y = jnp.where(y > 0, y, 0.2 * y)                   # LeakyReLU(0.2)
    else:                                                  # stable sigmoid (EUP tanh)
        y = 0.5 * (jnp.tanh(0.5 * y) + 1.0)
    o_ref[...] = y


def _conv_stats_kernel(p_ref, w_ref, y_ref, stat_ref):
    """GEMM pass for BN layers: writes the pre-BN tile and accumulates exact
    per-channel sum / sum-of-squares across the (arbitrary) M grid axis."""
    y = jnp.dot(p_ref[...], w_ref[...], preferred_element_type=jnp.float32)
    y_ref[...] = y

    s = jnp.sum(y, axis=0, keepdims=True)                  # (1, Cp)
    sq = jnp.sum(y * y, axis=0, keepdims=True)             # (1, Cp)
    upd = jnp.concatenate(
        [s, sq, jnp.zeros((_SUB - 2, s.shape[1]), jnp.float32)], axis=0)

    @pl.when(pl.program_id(0) == 0)
    def _init():
        stat_ref[...] = jnp.zeros_like(stat_ref)

    stat_ref[...] += upd


def _bn_act_kernel(y_ref, sb_ref, o_ref):
    """Folded BatchNorm (y*scale + bias) + LeakyReLU(0.2)."""
    y = y_ref[...] * sb_ref[0:1, :] + sb_ref[1:2, :]
    o_ref[...] = jnp.where(y > 0, y, 0.2 * y)


# ---------------------------------------------------------------------------
# Plain-JAX glue (patch extraction) + per-layer driver
# ---------------------------------------------------------------------------
def _im2col_nhwc(x, kh, kw, stride, pad):
    """(N, H, W, C) -> (N*Ho*Wo, kh*kw*C) patches (tap-major, channel-minor)."""
    N, H, W, C = x.shape
    xp = jnp.pad(x, ((0, 0), (pad, pad), (pad, pad), (0, 0)))
    Ho = (H + 2 * pad - kh) // stride + 1
    Wo = (W + 2 * pad - kw) // stride + 1
    cols = []
    for i in range(kh):
        for j in range(kw):
            cols.append(xp[:, i:i + stride * Ho:stride, j:j + stride * Wo:stride, :])
    p = jnp.stack(cols, axis=3)                            # (N, Ho, Wo, kh*kw, C)
    return p.reshape(N * Ho * Wo, kh * kw * C), Ho, Wo


def _conv_layer(x, w, gamma, beta, *, stride, pad, use_bn, act, eps=1e-5):
    N = x.shape[0]
    Cout, Cin, kh, kw = w.shape
    patches, Ho, Wo = _im2col_nhwc(x, kh, kw, stride, pad)
    M, K = patches.shape

    Kp = _round_up(K, _LANE)
    Cp = _round_up(Cout, _LANE)
    Mp = _round_up(M, _SUB)
    tm = _TM if Mp >= _TM else Mp
    Mp = _round_up(Mp, tm)
    grid = (Mp // tm,)

    # bf16 MXU inputs (f32 accumulation inside the kernel); zero padding keeps
    # the GEMM exact and makes every load/store lane-dense.
    p_pad = jnp.pad(patches, ((0, Mp - M), (0, Kp - K))).astype(jnp.bfloat16)
    w_mat = jnp.transpose(w, (2, 3, 1, 0)).reshape(K, Cout)   # (kh*kw*Cin, Cout)
    w_pad = jnp.pad(w_mat, ((0, Kp - K), (0, Cp - Cout))).astype(jnp.bfloat16)

    p_spec = pl.BlockSpec((tm, Kp), lambda i: (i, 0))
    w_spec = pl.BlockSpec((Kp, Cp), lambda i: (0, 0))
    y_spec = pl.BlockSpec((tm, Cp), lambda i: (i, 0))
    vec_spec = pl.BlockSpec((_SUB, Cp), lambda i: (0, 0))
    par_params = pltpu.CompilerParams(dimension_semantics=("parallel",),
                                      vmem_limit_bytes=_VMEM_LIMIT)

    if not use_bn:
        y = pl.pallas_call(
            functools.partial(_conv_act_kernel, act=act),
            out_shape=jax.ShapeDtypeStruct((Mp, Cp), jnp.float32),
            grid=grid,
            in_specs=[p_spec, w_spec],
            out_specs=y_spec,
            compiler_params=par_params,
        )(p_pad, w_pad)
    else:
        # Pass 1: GEMM + exact batch stats reduced across the M tiles.
        y_raw, stats = pl.pallas_call(
            _conv_stats_kernel,
            out_shape=(jax.ShapeDtypeStruct((Mp, Cp), jnp.float32),
                       jax.ShapeDtypeStruct((_SUB, Cp), jnp.float32)),
            grid=grid,
            in_specs=[p_spec, w_spec],
            out_specs=(y_spec, vec_spec),
            compiler_params=pltpu.CompilerParams(
                dimension_semantics=("arbitrary",),     # stats block is revisited
                vmem_limit_bytes=_VMEM_LIMIT),
        )(p_pad, w_pad)

        # Fold training-mode BatchNorm2d (biased batch stats over N,H,W) into a
        # single per-channel scale/bias.  Zero-padded rows/channels contribute
        # nothing to the sums, so dividing by the true M keeps stats exact.
        mean = stats[0] / float(M)
        var = stats[1] / float(M) - mean * mean
        gamma_p = jnp.ones((Cp,), jnp.float32).at[:Cout].set(gamma)
        beta_p = jnp.zeros((Cp,), jnp.float32).at[:Cout].set(beta)
        scale = gamma_p * jax.lax.rsqrt(var + eps)
        bias = beta_p - mean * scale
        sb = jnp.zeros((_SUB, Cp), jnp.float32).at[0].set(scale).at[1].set(bias)

        # Pass 2: normalize + LeakyReLU; M tiles are independent.
        y = pl.pallas_call(
            _bn_act_kernel,
            out_shape=jax.ShapeDtypeStruct((Mp, Cp), jnp.float32),
            grid=grid,
            in_specs=[y_spec, vec_spec],
            out_specs=y_spec,
            compiler_params=par_params,
        )(y_raw, sb)

    return y[:M, :Cout].reshape(N, Ho, Wo, Cout)


# (name, stride, pad, use_bn, activation) — mirrors nn.Sequential in Discriminator
_LAYER_CFG = [
    ("conv1", 2, 1, False, "lrelu"),
    ("conv2", 2, 1, True,  "lrelu"),
    ("conv3", 2, 1, True,  "lrelu"),
    ("conv4", 2, 1, True,  "lrelu"),
    ("conv5", 1, 0, False, "sigmoid"),
]


def discriminator_forward(x_nchw, params):
    # NCHW (PyTorch convention) -> NHWC once at the boundary; channels-last inside.
    x = jnp.transpose(x_nchw, (0, 2, 3, 1))
    for name, stride, pad, use_bn, act in _LAYER_CFG:
        x = _conv_layer(
            x, params[name + "_w"],
            params.get(name + "_gamma"), params.get(name + "_beta"),
            stride=stride, pad=pad, use_bn=use_bn, act=act)
    return jnp.transpose(x, (0, 3, 1, 2))                  # back to NCHW


def make_params(key, nc, ndf):
    """Deterministic synthetic parameters (DCGAN-style: conv ~ N(0, 0.02))."""
    ks = jax.random.split(key, 5)
    chans = [(nc, ndf), (ndf, ndf * 2), (ndf * 2, ndf * 4),
             (ndf * 4, ndf * 8), (ndf * 8, 1)]
    params = {}
    for idx, ((cin, cout), k) in enumerate(zip(chans, ks), start=1):
        params[f"conv{idx}_w"] = 0.02 * jax.random.normal(
            k, (cout, cin, 4, 4), jnp.float32)
    for idx, cout in [(2, ndf * 2), (3, ndf * 4), (4, ndf * 8)]:
        params[f"conv{idx}_gamma"] = jnp.ones((cout,), jnp.float32)
        params[f"conv{idx}_beta"] = jnp.zeros((cout,), jnp.float32)
    return params


if __name__ == "__main__":
    nc, ndf, batch = 3, 8, 2
    key = jax.random.PRNGKey(0)
    k_params, k_x = jax.random.split(key)

    params = make_params(k_params, nc, ndf)
    # 64x64 spatial is required by the 5-conv DCGAN discriminator topology.
    x = jax.random.normal(k_x, (batch, nc, 64, 64), jnp.float32)

    fwd = jax.jit(discriminator_forward)
    out = jax.block_until_ready(fwd(x, params))

    assert out.shape == (batch, 1, 1, 1), out.shape
    assert bool(jnp.all((out >= 0.0) & (out <= 1.0)))      # sigmoid range
    print("KERNEL_OK")
</pallas_src>

<mosaic_0001>
module attributes {stable_mosaic.version = 11 : i64} {
  func.func @_conv_act_kernel(%arg0: i32, %arg1: memref<256x128xbf16, #tpu.memory_space<vmem>>, %arg2: memref<128x128xbf16, #tpu.memory_space<vmem>>, %arg3: memref<256x128xf32, #tpu.memory_space<vmem>>) attributes {dimension_semantics = [#tpu.dimension_semantics<parallel>], iteration_bounds = array<i64: 8>, scalar_prefetch = 0 : i64, scratch_operands = 0 : i64, tpu.core_type = #tpu.core_type<tc>, window_params = [{transform_indices = @transform_0, window_bounds = array<i64: 256, 128>}, {pipeline_mode = #tpu.pipeline_mode<synchronous>, transform_indices = @transform_1, window_bounds = array<i64: 128, 128>}, {transform_indices = @transform_2, window_bounds = array<i64: 256, 128>}]} {
    %c0 = arith.constant 0 : index
    %c0_0 = arith.constant 0 : index
    %0 = vector.load %arg1[%c0, %c0_0] : memref<256x128xbf16, #tpu.memory_space<vmem>>, vector<256x128xbf16>
    %c0_1 = arith.constant 0 : index
    %c0_2 = arith.constant 0 : index
    %1 = vector.load %arg2[%c0_1, %c0_2] : memref<128x128xbf16, #tpu.memory_space<vmem>>, vector<128x128xbf16>
    %cst = arith.constant dense<0.000000e+00> : vector<256x128xf32>
    %2 = tpu.matmul %0, %1, %cst {dimension_numbers = #tpu.dot_dimension_numbers<[1], [0], [0], [1], [0, 0, 1, 1], [], []>} : vector<256x128xbf16>, vector<128x128xbf16>, vector<256x128xf32> -> vector<256x128xf32>
    %cst_3 = arith.constant 0.000000e+00 : f32
    %3 = vector.broadcast %cst_3 : f32 to vector<256x128xf32>
    %4 = arith.cmpf ogt, %2, %3 : vector<256x128xf32>
    %cst_4 = arith.constant 2.000000e-01 : f32
    %5 = vector.broadcast %cst_4 : f32 to vector<256x128xf32>
    %6 = arith.mulf %5, %2 : vector<256x128xf32>
    %7 = arith.select %4, %2, %6 : vector<256x128xi1>, vector<256x128xf32>
    %c0_5 = arith.constant 0 : index
    %c0_6 = arith.constant 0 : index
    %8 = vector.load %arg3[%c0_5, %c0_6] : memref<256x128xf32, #tpu.memory_space<vmem>>, vector<256x128xf32>
    tpu.vector_store %arg3[%c0_5, %c0_6], %7 {strides = array<i32>} : memref<256x128xf32, #tpu.memory_space<vmem>>, vector<256x128xf32>,
    return
  }
  func.func @transform_0(%arg0: i32) -> (i32, i32) {
    %c0_i32 = arith.constant 0 : i32
    %c0_i32_0 = arith.constant 0 : i32
    return %arg0, %c0_i32 : i32, i32
  }
  func.func @transform_1(%arg0: i32) -> (i32, i32) {
    %c0_i32 = arith.constant 0 : i32
    %c0_i32_0 = arith.constant 0 : i32
    %c0_i32_1 = arith.constant 0 : i32
    return %c0_i32, %c0_i32_0 : i32, i32
  }
  func.func @transform_2(%arg0: i32) -> (i32, i32) {
    %c0_i32 = arith.constant 0 : i32
    %c0_i32_0 = arith.constant 0 : i32
    return %arg0, %c0_i32 : i32, i32
  }
}

module attributes {stable_mosaic.version = 11 : i64} {
  func.func @_conv_stats_kernel(%arg0: i32, %arg1: memref<256x128xbf16, #tpu.memory_space<vmem>>, %arg2: memref<128x128xbf16, #tpu.memory_space<vmem>>, %arg3: memref<256x128xf32, #tpu.memory_space<vmem>>, %arg4: memref<8x128xf32, #tpu.memory_space<vmem>>) attributes {dimension_semantics = [#tpu.dimension_semantics<arbitrary>], iteration_bounds = array<i64: 2>, scalar_prefetch = 0 : i64, scratch_operands = 0 : i64, tpu.core_type = #tpu.core_type<tc>, window_params = [{transform_indices = @transform_0, window_bounds = array<i64: 256, 128>}, {pipeline_mode = #tpu.pipeline_mode<synchronous>, transform_indices = @transform_1, window_bounds = array<i64: 128, 128>}, {transform_indices = @transform_2, window_bounds = array<i64: 256, 128>}, {pipeline_mode = #tpu.pipeline_mode<synchronous>, transform_indices = @transform_3, window_bounds = array<i64: 8, 128>}]} {
    %c0 = arith.constant 0 : index
    %c0_0 = arith.constant 0 : index
    %0 = vector.load %arg1[%c0, %c0_0] : memref<256x128xbf16, #tpu.memory_space<vmem>>, vector<256x128xbf16>
    %c0_1 = arith.constant 0 : index
    %c0_2 = arith.constant 0 : index
    %1 = vector.load %arg2[%c0_1, %c0_2] : memref<128x128xbf16, #tpu.memory_space<vmem>>, vector<128x128xbf16>
    %cst = arith.constant dense<0.000000e+00> : vector<256x128xf32>
    %2 = tpu.matmul %0, %1, %cst {dimension_numbers = #tpu.dot_dimension_numbers<[1], [0], [0], [1], [0, 0, 1, 1], [], []>} : vector<256x128xbf16>, vector<128x128xbf16>, vector<256x128xf32> -> vector<256x128xf32>
    %c0_3 = arith.constant 0 : index
    %c0_4 = arith.constant 0 : index
    %3 = vector.load %arg3[%c0_3, %c0_4] : memref<256x128xf32, #tpu.memory_space<vmem>>, vector<256x128xf32>
    tpu.vector_store %arg3[%c0_3, %c0_4], %2 {strides = array<i32>} : memref<256x128xf32, #tpu.memory_space<vmem>>, vector<256x128xf32>,
    %cst_5 = arith.constant dense<0.000000e+00> : vector<128xf32>
    %4 = vector.multi_reduction <add>, %2, %cst_5 [0] : vector<256x128xf32> to vector<128xf32>
    %5 = vector.shape_cast %4 : vector<128xf32> to vector<1x128xf32>
    %6 = arith.mulf %2, %2 : vector<256x128xf32>
    %cst_6 = arith.constant dense<0.000000e+00> : vector<128xf32>
    %7 = vector.multi_reduction <add>, %6, %cst_6 [0] : vector<256x128xf32> to vector<128xf32>
    %8 = vector.shape_cast %7 : vector<128xf32> to vector<1x128xf32>
    %cst_7 = arith.constant 0.000000e+00 : f32
    %9 = vector.broadcast %cst_7 : f32 to vector<6x128xf32>
    %10 = tpu.concatenate %5, %8, %9 in 0 : vector<1x128xf32>, vector<1x128xf32>, vector<6x128xf32> -> vector<8x128xf32>
    %c0_i32 = arith.constant 0 : i32
    %11 = arith.cmpi eq, %arg0, %c0_i32 : i32
    %12 = arith.extui %11 : i1 to i32
    %c0_i32_8 = arith.constant 0 : i32
    %13 = arith.cmpi ne, %12, %c0_i32_8 : i32
    scf.if %13 {
      %cst_13 = arith.constant 0.000000e+00 : f32
      %17 = vector.broadcast %cst_13 : f32 to vector<8x128xf32>
      %c0_14 = arith.constant 0 : index
      %c0_15 = arith.constant 0 : index
      %18 = vector.load %arg4[%c0_14, %c0_15] : memref<8x128xf32, #tpu.memory_space<vmem>>, vector<8x128xf32>
      tpu.vector_store %arg4[%c0_14, %c0_15], %17 {strides = array<i32>} : memref<8x128xf32, #tpu.memory_space<vmem>>, vector<8x128xf32>,
    } else {
    }
    %c0_9 = arith.constant 0 : index
    %c0_10 = arith.constant 0 : index
    %14 = vector.load %arg4[%c0_9, %c0_10] : memref<8x128xf32, #tpu.memory_space<vmem>>, vector<8x128xf32>
    %15 = arith.addf %14, %10 : vector<8x128xf32>
    %c0_11 = arith.constant 0 : index
    %c0_12 = arith.constant 0 : index
    %16 = vector.load %arg4[%c0_11, %c0_12] : memref<8x128xf32, #tpu.memory_space<vmem>>, vector<8x128xf32>
    tpu.vector_store %arg4[%c0_11, %c0_12], %15 {strides = array<i32>} : memref<8x128xf32, #tpu.memory_space<vmem>>, vector<8x128xf32>,
    return
  }
  func.func @transform_0(%arg0: i32) -> (i32, i32) {
    %c0_i32 = arith.constant 0 : i32
    %c0_i32_0 = arith.constant 0 : i32
    return %arg0, %c0_i32 : i32, i32
  }
  func.func @transform_1(%arg0: i32) -> (i32, i32) {
    %c0_i32 = arith.constant 0 : i32
    %c0_i32_0 = arith.constant 0 : i32
    %c0_i32_1 = arith.constant 0 : i32
    return %c0_i32, %c0_i32_0 : i32, i32
  }
  func.func @transform_2(%arg0: i32) -> (i32, i32) {
    %c0_i32 = arith.constant 0 : i32
    %c0_i32_0 = arith.constant 0 : i32
    return %arg0, %c0_i32 : i32, i32
  }
  func.func @transform_3(%arg0: i32) -> (i32, i32) {
    %c0_i32 = arith.constant 0 : i32
    %c0_i32_0 = arith.constant 0 : i32
    %c0_i32_1 = arith.constant 0 : i32
    return %c0_i32, %c0_i32_0 : i32, i32
  }
}

module attributes {stable_mosaic.version = 11 : i64} {
  func.func @_bn_act_kernel(%arg0: i32, %arg1: memref<256x128xf32, #tpu.memory_space<vmem>>, %arg2: memref<8x128xf32, #tpu.memory_space<vmem>>, %arg3: memref<256x128xf32, #tpu.memory_space<vmem>>) attributes {dimension_semantics = [#tpu.dimension_semantics<parallel>], iteration_bounds = array<i64: 2>, scalar_prefetch = 0 : i64, scratch_operands = 0 : i64, tpu.core_type = #tpu.core_type<tc>, window_params = [{transform_indices = @transform_0, window_bounds = array<i64: 256, 128>}, {pipeline_mode = #tpu.pipeline_mode<synchronous>, transform_indices = @transform_1, window_bounds = array<i64: 8, 128>}, {transform_indices = @transform_2, window_bounds = array<i64: 256, 128>}]} {
    %c0 = arith.constant 0 : index
    %c0_0 = arith.constant 0 : index
    %0 = vector.load %arg1[%c0, %c0_0] : memref<256x128xf32, #tpu.memory_space<vmem>>, vector<256x128xf32>
    %c0_1 = arith.constant 0 : index
    %c0_2 = arith.constant 0 : index
    %1 = vector.load %arg2[%c0_1, %c0_2] : memref<8x128xf32, #tpu.memory_space<vmem>>, vector<1x128xf32>
    %2 = vector.broadcast %1 : vector<1x128xf32> to vector<256x128xf32>
    %3 = arith.mulf %0, %2 : vector<256x128xf32>
    %c1 = arith.constant 1 : index
    %c0_3 = arith.constant 0 : index
    %4 = vector.load %arg2[%c1, %c0_3] : memref<8x128xf32, #tpu.memory_space<vmem>>, vector<1x128xf32>
    %5 = vector.broadcast %4 : vector<1x128xf32> to vector<256x128xf32>
    %6 = arith.addf %3, %5 : vector<256x128xf32>
    %cst = arith.constant 0.000000e+00 : f32
    %7 = vector.broadcast %cst : f32 to vector<256x128xf32>
    %8 = arith.cmpf ogt, %6, %7 : vector<256x128xf32>
    %cst_4 = arith.constant 2.000000e-01 : f32
    %9 = vector.broadcast %cst_4 : f32 to vector<256x128xf32>
    %10 = arith.mulf %9, %6 : vector<256x128xf32>
    %11 = arith.select %8, %6, %10 : vector<256x128xi1>, vector<256x128xf32>
    %c0_5 = arith.constant 0 : index
    %c0_6 = arith.constant 0 : index
    %12 = vector.load %arg3[%c0_5, %c0_6] : memref<256x128xf32, #tpu.memory_space<vmem>>, vector<256x128xf32>
    tpu.vector_store %arg3[%c0_5, %c0_6], %11 {strides = array<i32>} : memref<256x128xf32, #tpu.memory_space<vmem>>, vector<256x128xf32>,
    return
  }
  func.func @transform_0(%arg0: i32) -> (i32, i32) {
    %c0_i32 = arith.constant 0 : i32
    %c0_i32_0 = arith.constant 0 : i32
    return %arg0, %c0_i32 : i32, i32
  }
  func.func @transform_1(%arg0: i32) -> (i32, i32) {
    %c0_i32 = arith.constant 0 : i32
    %c0_i32_0 = arith.constant 0 : i32
    %c0_i32_1 = arith.constant 0 : i32
    return %c0_i32, %c0_i32_0 : i32, i32
  }
  func.func @transform_2(%arg0: i32) -> (i32, i32) {
    %c0_i32 = arith.constant 0 : i32
    %c0_i32_0 = arith.constant 0 : i32
    return %arg0, %c0_i32 : i32, i32
  }
}

module attributes {stable_mosaic.version = 11 : i64} {
  func.func @_conv_stats_kernel(%arg0: i32, %arg1: memref<128x256xbf16, #tpu.memory_space<vmem>>, %arg2: memref<256x128xbf16, #tpu.memory_space<vmem>>, %arg3: memref<128x128xf32, #tpu.memory_space<vmem>>, %arg4: memref<8x128xf32, #tpu.memory_space<vmem>>) attributes {dimension_semantics = [#tpu.dimension_semantics<arbitrary>], iteration_bounds = array<i64: 1>, scalar_prefetch = 0 : i64, scratch_operands = 0 : i64, tpu.core_type = #tpu.core_type<tc>, window_params = [{transform_indices = @transform_0, window_bounds = array<i64: 128, 256>}, {pipeline_mode = #tpu.pipeline_mode<synchronous>, transform_indices = @transform_1, window_bounds = array<i64: 256, 128>}, {transform_indices = @transform_2, window_bounds = array<i64: 128, 128>}, {pipeline_mode = #tpu.pipeline_mode<synchronous>, transform_indices = @transform_3, window_bounds = array<i64: 8, 128>}]} {
    %c0 = arith.constant 0 : index
    %c0_0 = arith.constant 0 : index
    %0 = vector.load %arg1[%c0, %c0_0] : memref<128x256xbf16, #tpu.memory_space<vmem>>, vector<128x256xbf16>
    %c0_1 = arith.constant 0 : index
    %c0_2 = arith.constant 0 : index
    %1 = vector.load %arg2[%c0_1, %c0_2] : memref<256x128xbf16, #tpu.memory_space<vmem>>, vector<256x128xbf16>
    %cst = arith.constant dense<0.000000e+00> : vector<128x128xf32>
    %2 = tpu.matmul %0, %1, %cst {dimension_numbers = #tpu.dot_dimension_numbers<[1], [0], [0], [1], [0, 0, 1, 1], [], []>} : vector<128x256xbf16>, vector<256x128xbf16>, vector<128x128xf32> -> vector<128x128xf32>
    %c0_3 = arith.constant 0 : index
    %c0_4 = arith.constant 0 : index
    %3 = vector.load %arg3[%c0_3, %c0_4] : memref<128x128xf32, #tpu.memory_space<vmem>>, vector<128x128xf32>
    tpu.vector_store %arg3[%c0_3, %c0_4], %2 {strides = array<i32>} : memref<128x128xf32, #tpu.memory_space<vmem>>, vector<128x128xf32>,
    %cst_5 = arith.constant dense<0.000000e+00> : vector<128xf32>
    %4 = vector.multi_reduction <add>, %2, %cst_5 [0] : vector<128x128xf32> to vector<128xf32>
    %5 = vector.shape_cast %4 : vector<128xf32> to vector<1x128xf32>
    %6 = arith.mulf %2, %2 : vector<128x128xf32>
    %cst_6 = arith.constant dense<0.000000e+00> : vector<128xf32>
    %7 = vector.multi_reduction <add>, %6, %cst_6 [0] : vector<128x128xf32> to vector<128xf32>
    %8 = vector.shape_cast %7 : vector<128xf32> to vector<1x128xf32>
    %cst_7 = arith.constant 0.000000e+00 : f32
    %9 = vector.broadcast %cst_7 : f32 to vector<6x128xf32>
    %10 = tpu.concatenate %5, %8, %9 in 0 : vector<1x128xf32>, vector<1x128xf32>, vector<6x128xf32> -> vector<8x128xf32>
    %c0_i32 = arith.constant 0 : i32
    %11 = arith.cmpi eq, %arg0, %c0_i32 : i32
    %12 = arith.extui %11 : i1 to i32
    %c0_i32_8 = arith.constant 0 : i32
    %13 = arith.cmpi ne, %12, %c0_i32_8 : i32
    scf.if %13 {
      %cst_13 = arith.constant 0.000000e+00 : f32
      %17 = vector.broadcast %cst_13 : f32 to vector<8x128xf32>
      %c0_14 = arith.constant 0 : index
      %c0_15 = arith.constant 0 : index
      %18 = vector.load %arg4[%c0_14, %c0_15] : memref<8x128xf32, #tpu.memory_space<vmem>>, vector<8x128xf32>
      tpu.vector_store %arg4[%c0_14, %c0_15], %17 {strides = array<i32>} : memref<8x128xf32, #tpu.memory_space<vmem>>, vector<8x128xf32>,
    } else {
    }
    %c0_9 = arith.constant 0 : index
    %c0_10 = arith.constant 0 : index
    %14 = vector.load %arg4[%c0_9, %c0_10] : memref<8x128xf32, #tpu.memory_space<vmem>>, vector<8x128xf32>
    %15 = arith.addf %14, %10 : vector<8x128xf32>
    %c0_11 = arith.constant 0 : index
    %c0_12 = arith.constant 0 : index
    %16 = vector.load %arg4[%c0_11, %c0_12] : memref<8x128xf32, #tpu.memory_space<vmem>>, vector<8x128xf32>
    tpu.vector_store %arg4[%c0_11, %c0_12], %15 {strides = array<i32>} : memref<8x128xf32, #tpu.memory_space<vmem>>, vector<8x128xf32>,
    return
  }
  func.func @transform_0(%arg0: i32) -> (i32, i32) {
    %c0_i32 = arith.constant 0 : i32
    %c0_i32_0 = arith.constant 0 : i32
    return %arg0, %c0_i32 : i32, i32
  }
  func.func @transform_1(%arg0: i32) -> (i32, i32) {
    %c0_i32 = arith.constant 0 : i32
    %c0_i32_0 = arith.constant 0 : i32
    %c0_i32_1 = arith.constant 0 : i32
    return %c0_i32, %c0_i32_0 : i32, i32
  }
  func.func @transform_2(%arg0: i32) -> (i32, i32) {
    %c0_i32 = arith.constant 0 : i32
    %c0_i32_0 = arith.constant 0 : i32
    return %arg0, %c0_i32 : i32, i32
  }
  func.func @transform_3(%arg0: i32) -> (i32, i32) {
    %c0_i32 = arith.constant 0 : i32
    %c0_i32_0 = arith.constant 0 : i32
    %c0_i32_1 = arith.constant 0 : i32
    return %c0_i32, %c0_i32_0 : i32, i32
  }
}

module attributes {stable_mosaic.version = 11 : i64} {
  func.func @_bn_act_kernel(%arg0: i32, %arg1: memref<128x128xf32, #tpu.memory_space<vmem>>, %arg2: memref<8x128xf32, #tpu.memory_space<vmem>>, %arg3: memref<128x128xf32, #tpu.memory_space<vmem>>) attributes {dimension_semantics = [#tpu.dimension_semantics<parallel>], iteration_bounds = array<i64: 1>, scalar_prefetch = 0 : i64, scratch_operands = 0 : i64, tpu.core_type = #tpu.core_type<tc>, window_params = [{transform_indices = @transform_0, window_bounds = array<i64: 128, 128>}, {pipeline_mode = #tpu.pipeline_mode<synchronous>, transform_indices = @transform_1, window_bounds = array<i64: 8, 128>}, {transform_indices = @transform_2, window_bounds = array<i64: 128, 128>}]} {
    %c0 = arith.constant 0 : index
    %c0_0 = arith.constant 0 : index
    %0 = vector.load %arg1[%c0, %c0_0] : memref<128x128xf32, #tpu.memory_space<vmem>>, vector<128x128xf32>
    %c0_1 = arith.constant 0 : index
    %c0_2 = arith.constant 0 : index
    %1 = vector.load %arg2[%c0_1, %c0_2] : memref<8x128xf32, #tpu.memory_space<vmem>>, vector<1x128xf32>
    %2 = vector.broadcast %1 : vector<1x128xf32> to vector<128x128xf32>
    %3 = arith.mulf %0, %2 : vector<128x128xf32>
    %c1 = arith.constant 1 : index
    %c0_3 = arith.constant 0 : index
    %4 = vector.load %arg2[%c1, %c0_3] : memref<8x128xf32, #tpu.memory_space<vmem>>, vector<1x128xf32>
    %5 = vector.broadcast %4 : vector<1x128xf32> to vector<128x128xf32>
    %6 = arith.addf %3, %5 : vector<128x128xf32>
    %cst = arith.constant 0.000000e+00 : f32
    %7 = vector.broadcast %cst : f32 to vector<128x128xf32>
    %8 = arith.cmpf ogt, %6, %7 : vector<128x128xf32>
    %cst_4 = arith.constant 2.000000e-01 : f32
    %9 = vector.broadcast %cst_4 : f32 to vector<128x128xf32>
    %10 = arith.mulf %9, %6 : vector<128x128xf32>
    %11 = arith.select %8, %6, %10 : vector<128x128xi1>, vector<128x128xf32>
    %c0_5 = arith.constant 0 : index
    %c0_6 = arith.constant 0 : index
    %12 = vector.load %arg3[%c0_5, %c0_6] : memref<128x128xf32, #tpu.memory_space<vmem>>, vector<128x128xf32>
    tpu.vector_store %arg3[%c0_5, %c0_6], %11 {strides = array<i32>} : memref<128x128xf32, #tpu.memory_space<vmem>>, vector<128x128xf32>,
    return
  }
  func.func @transform_0(%arg0: i32) -> (i32, i32) {
    %c0_i32 = arith.constant 0 : i32
    %c0_i32_0 = arith.constant 0 : i32
    return %arg0, %c0_i32 : i32, i32
  }
  func.func @transform_1(%arg0: i32) -> (i32, i32) {
    %c0_i32 = arith.constant 0 : i32
    %c0_i32_0 = arith.constant 0 : i32
    %c0_i32_1 = arith.constant 0 : i32
    return %c0_i32, %c0_i32_0 : i32, i32
  }
  func.func @transform_2(%arg0: i32) -> (i32, i32) {
    %c0_i32 = arith.constant 0 : i32
    %c0_i32_0 = arith.constant 0 : i32
    return %arg0, %c0_i32 : i32, i32
  }
}

module attributes {stable_mosaic.version = 11 : i64} {
  func.func @_conv_stats_kernel(%arg0: i32, %arg1: memref<32x512xbf16, #tpu.memory_space<vmem>>, %arg2: memref<512x128xbf16, #tpu.memory_space<vmem>>, %arg3: memref<32x128xf32, #tpu.memory_space<vmem>>, %arg4: memref<8x128xf32, #tpu.memory_space<vmem>>) attributes {dimension_semantics = [#tpu.dimension_semantics<arbitrary>], iteration_bounds = array<i64: 1>, scalar_prefetch = 0 : i64, scratch_operands = 0 : i64, tpu.core_type = #tpu.core_type<tc>, window_params = [{transform_indices = @transform_0, window_bounds = array<i64: 32, 512>}, {pipeline_mode = #tpu.pipeline_mode<synchronous>, transform_indices = @transform_1, window_bounds = array<i64: 512, 128>}, {transform_indices = @transform_2, window_bounds = array<i64: 32, 128>}, {pipeline_mode = #tpu.pipeline_mode<synchronous>, transform_indices = @transform_3, window_bounds = array<i64: 8, 128>}]} {
    %c0 = arith.constant 0 : index
    %c0_0 = arith.constant 0 : index
    %0 = vector.load %arg1[%c0, %c0_0] : memref<32x512xbf16, #tpu.memory_space<vmem>>, vector<32x512xbf16>
    %c0_1 = arith.constant 0 : index
    %c0_2 = arith.constant 0 : index
    %1 = vector.load %arg2[%c0_1, %c0_2] : memref<512x128xbf16, #tpu.memory_space<vmem>>, vector<512x128xbf16>
    %cst = arith.constant dense<0.000000e+00> : vector<32x128xf32>
    %2 = tpu.matmul %0, %1, %cst {dimension_numbers = #tpu.dot_dimension_numbers<[1], [0], [0], [1], [0, 0, 1, 1], [], []>} : vector<32x512xbf16>, vector<512x128xbf16>, vector<32x128xf32> -> vector<32x128xf32>
    %c0_3 = arith.constant 0 : index
    %c0_4 = arith.constant 0 : index
    %3 = vector.load %arg3[%c0_3, %c0_4] : memref<32x128xf32, #tpu.memory_space<vmem>>, vector<32x128xf32>
    tpu.vector_store %arg3[%c0_3, %c0_4], %2 {strides = array<i32>} : memref<32x128xf32, #tpu.memory_space<vmem>>, vector<32x128xf32>,
    %cst_5 = arith.constant dense<0.000000e+00> : vector<128xf32>
    %4 = vector.multi_reduction <add>, %2, %cst_5 [0] : vector<32x128xf32> to vector<128xf32>
    %5 = vector.shape_cast %4 : vector<128xf32> to vector<1x128xf32>
    %6 = arith.mulf %2, %2 : vector<32x128xf32>
    %cst_6 = arith.constant dense<0.000000e+00> : vector<128xf32>
    %7 = vector.multi_reduction <add>, %6, %cst_6 [0] : vector<32x128xf32> to vector<128xf32>
    %8 = vector.shape_cast %7 : vector<128xf32> to vector<1x128xf32>
    %cst_7 = arith.constant 0.000000e+00 : f32
    %9 = vector.broadcast %cst_7 : f32 to vector<6x128xf32>
    %10 = tpu.concatenate %5, %8, %9 in 0 : vector<1x128xf32>, vector<1x128xf32>, vector<6x128xf32> -> vector<8x128xf32>
    %c0_i32 = arith.constant 0 : i32
    %11 = arith.cmpi eq, %arg0, %c0_i32 : i32
    %12 = arith.extui %11 : i1 to i32
    %c0_i32_8 = arith.constant 0 : i32
    %13 = arith.cmpi ne, %12, %c0_i32_8 : i32
    scf.if %13 {
      %cst_13 = arith.constant 0.000000e+00 : f32
      %17 = vector.broadcast %cst_13 : f32 to vector<8x128xf32>
      %c0_14 = arith.constant 0 : index
      %c0_15 = arith.constant 0 : index
      %18 = vector.load %arg4[%c0_14, %c0_15] : memref<8x128xf32, #tpu.memory_space<vmem>>, vector<8x128xf32>
      tpu.vector_store %arg4[%c0_14, %c0_15], %17 {strides = array<i32>} : memref<8x128xf32, #tpu.memory_space<vmem>>, vector<8x128xf32>,
    } else {
    }
    %c0_9 = arith.constant 0 : index
    %c0_10 = arith.constant 0 : index
    %14 = vector.load %arg4[%c0_9, %c0_10] : memref<8x128xf32, #tpu.memory_space<vmem>>, vector<8x128xf32>
    %15 = arith.addf %14, %10 : vector<8x128xf32>
    %c0_11 = arith.constant 0 : index
    %c0_12 = arith.constant 0 : index
    %16 = vector.load %arg4[%c0_11, %c0_12] : memref<8x128xf32, #tpu.memory_space<vmem>>, vector<8x128xf32>
    tpu.vector_store %arg4[%c0_11, %c0_12], %15 {strides = array<i32>} : memref<8x128xf32, #tpu.memory_space<vmem>>, vector<8x128xf32>,
    return
  }
  func.func @transform_0(%arg0: i32) -> (i32, i32) {
    %c0_i32 = arith.constant 0 : i32
    %c0_i32_0 = arith.constant 0 : i32
    return %arg0, %c0_i32 : i32, i32
  }
  func.func @transform_1(%arg0: i32) -> (i32, i32) {
    %c0_i32 = arith.constant 0 : i32
    %c0_i32_0 = arith.constant 0 : i32
    %c0_i32_1 = arith.constant 0 : i32
    return %c0_i32, %c0_i32_0 : i32, i32
  }
  func.func @transform_2(%arg0: i32) -> (i32, i32) {
    %c0_i32 = arith.constant 0 : i32
    %c0_i32_0 = arith.constant 0 : i32
    return %arg0, %c0_i32 : i32, i32
  }
  func.func @transform_3(%arg0: i32) -> (i32, i32) {
    %c0_i32 = arith.constant 0 : i32
    %c0_i32_0 = arith.constant 0 : i32
    %c0_i32_1 = arith.constant 0 : i32
    return %c0_i32, %c0_i32_0 : i32, i32
  }
}

module attributes {stable_mosaic.version = 11 : i64} {
  func.func @_bn_act_kernel(%arg0: i32, %arg1: memref<32x128xf32, #tpu.memory_space<vmem>>, %arg2: memref<8x128xf32, #tpu.memory_space<vmem>>, %arg3: memref<32x128xf32, #tpu.memory_space<vmem>>) attributes {dimension_semantics = [#tpu.dimension_semantics<parallel>], iteration_bounds = array<i64: 1>, scalar_prefetch = 0 : i64, scratch_operands = 0 : i64, tpu.core_type = #tpu.core_type<tc>, window_params = [{transform_indices = @transform_0, window_bounds = array<i64: 32, 128>}, {pipeline_mode = #tpu.pipeline_mode<synchronous>, transform_indices = @transform_1, window_bounds = array<i64: 8, 128>}, {transform_indices = @transform_2, window_bounds = array<i64: 32, 128>}]} {
    %c0 = arith.constant 0 : index
    %c0_0 = arith.constant 0 : index
    %0 = vector.load %arg1[%c0, %c0_0] : memref<32x128xf32, #tpu.memory_space<vmem>>, vector<32x128xf32>
    %c0_1 = arith.constant 0 : index
    %c0_2 = arith.constant 0 : index
    %1 = vector.load %arg2[%c0_1, %c0_2] : memref<8x128xf32, #tpu.memory_space<vmem>>, vector<1x128xf32>
    %2 = vector.broadcast %1 : vector<1x128xf32> to vector<32x128xf32>
    %3 = arith.mulf %0, %2 : vector<32x128xf32>
    %c1 = arith.constant 1 : index
    %c0_3 = arith.constant 0 : index
    %4 = vector.load %arg2[%c1, %c0_3] : memref<8x128xf32, #tpu.memory_space<vmem>>, vector<1x128xf32>
    %5 = vector.broadcast %4 : vector<1x128xf32> to vector<32x128xf32>
    %6 = arith.addf %3, %5 : vector<32x128xf32>
    %cst = arith.constant 0.000000e+00 : f32
    %7 = vector.broadcast %cst : f32 to vector<32x128xf32>
    %8 = arith.cmpf ogt, %6, %7 : vector<32x128xf32>
    %cst_4 = arith.constant 2.000000e-01 : f32
    %9 = vector.broadcast %cst_4 : f32 to vector<32x128xf32>
    %10 = arith.mulf %9, %6 : vector<32x128xf32>
    %11 = arith.select %8, %6, %10 : vector<32x128xi1>, vector<32x128xf32>
    %c0_5 = arith.constant 0 : index
    %c0_6 = arith.constant 0 : index
    %12 = vector.load %arg3[%c0_5, %c0_6] : memref<32x128xf32, #tpu.memory_space<vmem>>, vector<32x128xf32>
    tpu.vector_store %arg3[%c0_5, %c0_6], %11 {strides = array<i32>} : memref<32x128xf32, #tpu.memory_space<vmem>>, vector<32x128xf32>,
    return
  }
  func.func @transform_0(%arg0: i32) -> (i32, i32) {
    %c0_i32 = arith.constant 0 : i32
    %c0_i32_0 = arith.constant 0 : i32
    return %arg0, %c0_i32 : i32, i32
  }
  func.func @transform_1(%arg0: i32) -> (i32, i32) {
    %c0_i32 = arith.constant 0 : i32
    %c0_i32_0 = arith.constant 0 : i32
    %c0_i32_1 = arith.constant 0 : i32
    return %c0_i32, %c0_i32_0 : i32, i32
  }
  func.func @transform_2(%arg0: i32) -> (i32, i32) {
    %c0_i32 = arith.constant 0 : i32
    %c0_i32_0 = arith.constant 0 : i32
    return %arg0, %c0_i32 : i32, i32
  }
}

module attributes {stable_mosaic.version = 11 : i64} {
  func.func @_conv_act_kernel(%arg0: i32, %arg1: memref<8x1024xbf16, #tpu.memory_space<vmem>>, %arg2: memref<1024x128xbf16, #tpu.memory_space<vmem>>, %arg3: memref<8x128xf32, #tpu.memory_space<vmem>>) attributes {dimension_semantics = [#tpu.dimension_semantics<parallel>], iteration_bounds = array<i64: 1>, scalar_prefetch = 0 : i64, scratch_operands = 0 : i64, tpu.core_type = #tpu.core_type<tc>, window_params = [{transform_indices = @transform_0, window_bounds = array<i64: 8, 1024>}, {pipeline_mode = #tpu.pipeline_mode<synchronous>, transform_indices = @transform_1, window_bounds = array<i64: 1024, 128>}, {transform_indices = @transform_2, window_bounds = array<i64: 8, 128>}]} {
    %c0 = arith.constant 0 : index
    %c0_0 = arith.constant 0 : index
    %0 = vector.load %arg1[%c0, %c0_0] : memref<8x1024xbf16, #tpu.memory_space<vmem>>, vector<8x1024xbf16>
    %c0_1 = arith.constant 0 : index
    %c0_2 = arith.constant 0 : index
    %1 = vector.load %arg2[%c0_1, %c0_2] : memref<1024x128xbf16, #tpu.memory_space<vmem>>, vector<1024x128xbf16>
    %cst = arith.constant dense<0.000000e+00> : vector<8x128xf32>
    %2 = tpu.matmul %0, %1, %cst {dimension_numbers = #tpu.dot_dimension_numbers<[1], [0], [0], [1], [0, 0, 1, 1], [], []>} : vector<8x1024xbf16>, vector<1024x128xbf16>, vector<8x128xf32> -> vector<8x128xf32>
    %cst_3 = arith.constant 5.000000e-01 : f32
    %3 = vector.broadcast %cst_3 : f32 to vector<8x128xf32>
    %4 = arith.mulf %3, %2 : vector<8x128xf32>
    %5 = math.tanh %4 : vector<8x128xf32>
    %cst_4 = arith.constant 1.000000e+00 : f32
    %6 = vector.broadcast %cst_4 : f32 to vector<8x128xf32>
    %7 = arith.addf %5, %6 : vector<8x128xf32>
    %cst_5 = arith.constant 5.000000e-01 : f32
    %8 = vector.broadcast %cst_5 : f32 to vector<8x128xf32>
    %9 = arith.mulf %8, %7 : vector<8x128xf32>
    %c0_6 = arith.constant 0 : index
    %c0_7 = arith.constant 0 : index
    %10 = vector.load %arg3[%c0_6, %c0_7] : memref<8x128xf32, #tpu.memory_space<vmem>>, vector<8x128xf32>
    tpu.vector_store %arg3[%c0_6, %c0_7], %9 {strides = array<i32>} : memref<8x128xf32, #tpu.memory_space<vmem>>, vector<8x128xf32>,
    return
  }
  func.func @transform_0(%arg0: i32) -> (i32, i32) {
    %c0_i32 = arith.constant 0 : i32
    %c0_i32_0 = arith.constant 0 : i32
    return %arg0, %c0_i32 : i32, i32
  }
  func.func @transform_1(%arg0: i32) -> (i32, i32) {
    %c0_i32 = arith.constant 0 : i32
    %c0_i32_0 = arith.constant 0 : i32
    %c0_i32_1 = arith.constant 0 : i32
    return %c0_i32, %c0_i32_0 : i32, i32
  }
  func.func @transform_2(%arg0: i32) -> (i32, i32) {
    %c0_i32 = arith.constant 0 : i32
    %c0_i32_0 = arith.constant 0 : i32
    return %arg0, %c0_i32 : i32, i32
  }
}

</mosaic_0001>

<bundles_post_ra>
// kernel: discriminator_forward.8
= control target key start
LH: loop header
LB: loop body
LE: loop exit
PB: predicated region body
PF: predicated region fallthrough
CT: control target
= control target key end

     0   :  { %s863_s9 = smov 0   ;;  %s960_s0 = inlined_call_operand.vmem [shape: bf16[2048,128], index: 0, kind: input, shape index: {}]   ;;  %s961_s1 = inlined_call_operand.vmem [shape: bf16[128,128], index: 1, kind: input, shape index: {}]   ;;  %s962_s2 = inlined_call_operand.vmem [shape: f32[2048,128], index: 2, kind: output, shape index: {}]  }
   0x1 LB: > { %s685_s10 = sadd.s32 4294967295, %s846_s9   ;;  %p689_p0 = scmp.ge.s32.totalorder %s846_s9, 1  ;;  %s846_s9 = sphi %s863_s9, %s12_s9  }
   0x2   : > { %p113_p1 = scmp.lt.s32.totalorder %s846_s9, 9 }
   0x4   : > { %p114_p2 = pnand %p689_p0, %p113_p1 }
   0x5   : > { %v816_v0 = vld [vmem:[%s961_s1] sm:$0xff] (!%p114_p2)   ;;  %s690_s13 = sshll.u32 (!%p114_p2), %s685_s10, 5  ;;  %v817_v1 = vld [vmem:[%s961_s1 + $0x8] sm:$0xff] (!%p114_p2)   ;;  %v818_v2 = vld [vmem:[%s961_s1 + $0x10] sm:$0xff] (!%p114_p2)  }
   0x6   : > { %117 = sbr.rel (%p114_p2) target bundleno = 284 (0x11c), region = 28  ;;  %p136_p3 = scmp.lt.s32.totalorder (!%p114_p2), %s690_s13, 255  ;;  %744 = vmatprep.subr.bf16.mxu0 (!%p114_p2), %v816_v0  ;;  %792 = vmatprep.subr.bf16.mxu1 (!%p114_p2), %v816_v0  ;;  %v819_v3 = vld [vmem:[%s961_s1 + $0x18] sm:$0xff] (!%p114_p2)   ;;  %v820_v6 = vld [vmem:[%s961_s1 + $0x20] sm:$0xff] (!%p114_p2)   ;;  %v821_v7 = vld [vmem:[%s961_s1 + $0x28] sm:$0xff] (!%p114_p2)  }
   0x7   : > { %745 = vmatpush3.bf16.msra.mxu0 (!%p114_p2), %v816_v0  ;;  %800 = vmatpush3.bf16.msra.mxu1 (!%p114_p2), %v816_v0  ;;  %v822_v8 = vld [vmem:[%s961_s1 + $0x30] sm:$0xff] (!%p114_p2)   ;;  %v823_v9 = vld [vmem:[%s961_s1 + $0x38] sm:$0xff] (!%p114_p2)  }
   0x8   : > { %746 = vmatprep.subr.bf16.mxu0 (!%p114_p2), %v817_v1  ;;  %793 = vmatprep.subr.bf16.mxu1 (!%p114_p2), %v817_v1 }
   0xb   : > { %747 = vmatpush3.bf16.msra.mxu0 (!%p114_p2), %v817_v1  ;;  %801 = vmatpush3.bf16.msra.mxu1 (!%p114_p2), %v817_v1 }
   0xc   : > { %748 = vmatprep.subr.bf16.mxu0 (!%p114_p2), %v818_v2  ;;  %794 = vmatprep.subr.bf16.mxu1 (!%p114_p2), %v818_v2 }
   0xd   : > { %s964_s13 = smov (!%p136_p3, %s690_s13), 255 }
   0xe   : > { %s691_s18 = sshll.u32 %s964_s13, 2  ;;  %s693_s4 = sshll.u32 %s964_s13, 3 }
   0xf   : > { %s886_s21 = scalar_lea.vmem %s960_s0, %s691_s18  ;;  %749 = vmatpush3.bf16.msra.mxu0 %v818_v2  ;;  %802 = vmatpush3.bf16.msra.mxu1 %v818_v2  ;;  %s923_s7 = scalar_lea.vmem %s962_s2, %s693_s4 }
  0x10   : > { %v824_v4 = vld [vmem:[%s886_s21] sm:$0xff]   ;;  %750 = vmatprep.subr.bf16.mxu0 %v819_v3  ;;  %795 = vmatprep.subr.bf16.mxu1 %v819_v3  ;;  %v826_v10 = vld [vmem:[%s886_s21 + $0x8] sm:$0xff]   ;;  %v828_v12 = vld [vmem:[%s886_s21 + $0x10] sm:$0xff]  }
  0x11   : > { %v825_v5 = vld [vmem:[%s886_s21 + $0x40] sm:$0xff]   ;;  %760 = vmatprep.mubr.bf16.mxu0 %v824_v4  ;;  %v827_v11 = vld [vmem:[%s886_s21 + $0x48] sm:$0xff]   ;;  %v829_v13 = vld [vmem:[%s886_s21 + $0x50] sm:$0xff]  }
  0x12   : > { %776 = vmatprep.mubr.bf16.mxu1 %v825_v5  ;;  %v830_v14 = vld [vmem:[%s886_s21 + $0x18] sm:$0xff]   ;;  %v832_v16 = vld [vmem:[%s886_s21 + $0x20] sm:$0xff]   ;;  %v834_v18 = vld [vmem:[%s886_s21 + $0x28] sm:$0xff]  }
  0x13   : > { %751 = vmatpush3.bf16.msra.mxu0 %v819_v3  ;;  %803 = vmatpush3.bf16.msra.mxu1 %v819_v3  ;;  %v831_v15 = vld [vmem:[%s886_s21 + $0x58] sm:$0xff]   ;;  %v833_v17 = vld [vmem:[%s886_s21 + $0x60] sm:$0xff]   ;;  %v835_v19 = vld [vmem:[%s886_s21 + $0x68] sm:$0xff]  }
  0x14   : > { %752 = vmatprep.subr.bf16.mxu0 %v820_v6  ;;  %796 = vmatprep.subr.bf16.mxu1 %v820_v6  ;;  %v836_v20 = vld [vmem:[%s886_s21 + $0x30] sm:$0xff]   ;;  %v838_v22 = vld [vmem:[%s886_s21 + $0x38] sm:$0xff]  }
  0x15   : > { %v837_v21 = vld [vmem:[%s886_s21 + $0x70] sm:$0xff]   ;;  %v839_v23 = vld [vmem:[%s886_s21 + $0x78] sm:$0xff]  }
  0x17   : > { %753 = vmatpush3.bf16.msra.mxu0 %v820_v6  ;;  %804 = vmatpush3.bf16.msra.mxu1 %v820_v6 }
  0x18   : > { %754 = vmatprep.subr.bf16.mxu0 %v821_v7  ;;  %797 = vmatprep.subr.bf16.mxu1 %v821_v7 }
  0x1b   : > { %755 = vmatpush3.bf16.msra.mxu0 %v821_v7  ;;  %805 = vmatpush3.bf16.msra.mxu1 %v821_v7 }
  0x1c   : > { %756 = vmatprep.subr.bf16.mxu0 %v822_v8  ;;  %798 = vmatprep.subr.bf16.mxu1 %v822_v8 }
  0x1f   : > { %757 = vmatpush3.bf16.msra.mxu0 %v822_v8  ;;  %806 = vmatpush3.bf16.msra.mxu1 %v822_v8 }
  0x20   : > { %758 = vmatprep.subr.bf16.mxu0 %v823_v9  ;;  %799 = vmatprep.subr.bf16.mxu1 %v823_v9 }
  0x23   : > { %759 = vmatpush3.bf16.msra.mxu0 %v823_v9  ;;  %807 = vmatpush3.bf16.msra.mxu1 %v823_v9 }
  0x26   : > { %761 = vmatmul.mubr.bf16.vlgmr.msra.gmra.mrb[0].mxu0 %v826_v10  ;;  %777 = vmatmul.mubr.bf16.vlgmr.msra.gmra.mrb[0].mxu1 %v827_v11 }
  0x27   : > { %764 = vmatprep.mubr.bf16.mxu0 %v828_v12  ;;  %780 = vmatprep.mubr.bf16.mxu1 %v829_v13 }
  0x2e   : > { %765 = vmatmul.mubr.bf16.gmra.mrb[4].mxu0 %v830_v14  ;;  %781 = vmatmul.mubr.bf16.gmra.mrb[4].mxu1 %v831_v15 }
  0x2f   : > { %768 = vmatprep.mubr.bf16.mxu0 %v832_v16  ;;  %784 = vmatprep.mubr.bf16.mxu1 %v833_v17 }
  0x36   : > { %769 = vmatmul.mubr.bf16.gmra.mrb[8].mxu0 %v834_v18  ;;  %785 = vmatmul.mubr.bf16.gmra.mrb[8].mxu1 %v835_v19 }
  0x37   : > { %772 = vmatprep.mubr.bf16.mxu0 %v836_v20  ;;  %788 = vmatprep.mubr.bf16.mxu1 %v837_v21 }
  0x3e   : > { %773 = vmatmul.mubr.bf16.gmra.mrb[12].mxu0 %v838_v22  ;;  %789 = vmatmul.mubr.bf16.gmra.mrb[12].mxu1 %v839_v23 }
  0xf9   : > { %v762_v24 = vpop.f32.mrb[0].mxu0  ;;  %v778_v25 = vpop.f32.mrb[0].mxu1 }
  0xfa   : > { %vm503_vm0 = vcmp.gt.f32.partialorder %v762_v24, 0.0  ;;  %v535_v26 = vmul.f32 0.2, %v762_v24  ;;  %vm519_vm1 = vcmp.gt.f32.partialorder %v778_v25, 0.0  ;;  %v551_v27 = vmul.f32 0.2, %v778_v25 }
  0xfb   : > { %v374_v28 = vpop.f32.mrb[1].mxu0  ;;  %v438_v29 = vpop.f32.mrb[1].mxu1 }
  0xfc   : > { %v567_v30 = vsel %vm503_vm0, %v762_v24, %v535_v26  ;;  %v583_v31 = vsel %vm519_vm1, %v778_v25, %v551_v27  ;;  %vm501_vm2 = vcmp.gt.f32.partialorder %v374_v28, 0.0  ;;  %v533_v32 = vmul.f32 0.2, %v374_v28  ;;  %v763_v33 = vpop.f32.mrb[2].mxu0  ;;  %v779_v34 = vpop.f32.mrb[2].mxu1 }
  0xfd   : > { %599 = vst [vmem:[%s923_s7 + $0x10] sm:$0xff] %v567_v30  ;;  %615 = vst [vmem:[%s923_s7 + $0x90] sm:$0xff] %v583_v31  ;;  %vm517_vm3 = vcmp.gt.f32.partialorder %v438_v29, 0.0  ;;  %v549_v35 = vmul.f32 0.2, %v438_v29  ;;  %vm504_vm4 = vcmp.gt.f32.partialorder %v763_v33, 0.0 }
  0xfe   : > { %v536_v36 = vmul.f32 0.2, %v763_v33  ;;  %v565_v37 = vsel %vm501_vm2, %v374_v28, %v533_v32  ;;  %vm520_vm5 = vcmp.gt.f32.partialorder %v779_v34, 0.0  ;;  %v552_v38 = vmul.f32 0.2, %v779_v34  ;;  %v377_v39 = vpop.f32.mrb[3].mxu0 }
  0xff   : > { %v441_v40 = vpop.f32.mrb[3].mxu1  ;;  %597 = vst [vmem:[%s923_s7] sm:$0xff] %v565_v37  ;;  %v581_v41 = vsel %vm517_vm3, %v438_v29, %v549_v35  ;;  %vm502_vm6 = vcmp.gt.f32.partialorder %v377_v39, 0.0  ;;  %v534_v43 = vmul.f32 0.2, %v377_v39 }
 0x100   : > { %v568_v42 = vsel %vm504_vm4, %v763_v33, %v536_v36  ;;  %613 = vst [vmem:[%s923_s7 + $0x80] sm:$0xff] %v581_v41  ;;  %v584_v44 = vsel %vm520_vm5, %v779_v34, %v552_v38  ;;  %vm518_vm7 = vcmp.gt.f32.partialorder %v441_v40, 0.0  ;;  %v550_v45 = vmul.f32 0.2, %v441_v40 }
 0x101   : > { %600 = vst [vmem:[%s923_s7 + $0x18] sm:$0xff] %v568_v42  ;;  %616 = vst [vmem:[%s923_s7 + $0x98] sm:$0xff] %v584_v44  ;;  %v566_v46 = vsel %vm502_vm6, %v377_v39, %v534_v43  ;;  %v766_v47 = vpop.f32.mrb[4].mxu0  ;;  %v782_v48 = vpop.f32.mrb[4].mxu1 }
 0x102   : > { %598 = vst [vmem:[%s923_s7 + $0x8] sm:$0xff] %v566_v46  ;;  %v582_v49 = vsel %vm518_vm7, %v441_v40, %v550_v45  ;;  %vm507_vm8 = vcmp.gt.f32.partialorder %v766_v47, 0.0  ;;  %v539_v50 = vmul.f32 0.2, %v766_v47  ;;  %vm523_vm9 = vcmp.gt.f32.partialorder %v782_v48, 0.0  ;;  %v390_v51 = vpop.f32.mrb[5].mxu0 }
 0x103   : > { %v454_v52 = vpop.f32.mrb[5].mxu1  ;;  %614 = vst [vmem:[%s923_s7 + $0x88] sm:$0xff] %v582_v49  ;;  %v555_v53 = vmul.f32 0.2, %v782_v48  ;;  %vm505_vm10 = vcmp.gt.f32.partialorder %v390_v51, 0.0  ;;  %v767_v57 = vpop.f32.mrb[6].mxu0 }
 0x104   : > { %v537_v54 = vmul.f32 0.2, %v390_v51  ;;  %vm521_vm11 = vcmp.gt.f32.partialorder %v454_v52, 0.0  ;;  %v571_v55 = vsel %vm507_vm8, %v766_v47, %v539_v50  ;;  %v553_v56 = vmul.f32 0.2, %v454_v52  ;;  %v783_v58 = vpop.f32.mrb[6].mxu1 }
 0x105   : > { %603 = vst [vmem:[%s923_s7 + $0x30] sm:$0xff] %v571_v55  ;;  %v587_v59 = vsel %vm523_vm9, %v782_v48, %v555_v53  ;;  %vm508_vm12 = vcmp.gt.f32.partialorder %v767_v57, 0.0  ;;  %v540_v61 = vmul.f32 0.2, %v767_v57  ;;  %v393_v62 = vpop.f32.mrb[7].mxu0  ;;  %v457_v63 = vpop.f32.mrb[7].mxu1 }
 0x106   : > { %v569_v60 = vsel %vm505_vm10, %v390_v51, %v537_v54  ;;  %619 = vst [vmem:[%s923_s7 + $0xb0] sm:$0xff] %v587_v59  ;;  %v585_v0 = vsel %vm521_vm11, %v454_v52, %v553_v56  ;;  %vm524_vm13 = vcmp.gt.f32.partialorder %v783_v58, 0.0  ;;  %v556_v1 = vmul.f32 0.2, %v783_v58 }
 0x107   : > { %601 = vst [vmem:[%s923_s7 + $0x20] sm:$0xff] %v569_v60  ;;  %vm506_vm14 = vcmp.gt.f32.partialorder %v393_v62, 0.0  ;;  %617 = vst [vmem:[%s923_s7 + $0xa0] sm:$0xff] %v585_v0  ;;  %v572_v2 = vsel %vm508_vm12, %v767_v57, %v540_v61  ;;  %v538_v3 = vmul.f32 0.2, %v393_v62  ;;  %vm522_vm15 = vcmp.gt.f32.partialorder %v457_v63, 0.0 }
 0x108   : > { %v554_v4 = vmul.f32 0.2, %v457_v63  ;;  %604 = vst [vmem:[%s923_s7 + $0x38] sm:$0xff] %v572_v2  ;;  %v588_v5 = vsel %vm524_vm13, %v783_v58, %v556_v1 }
 0x109   : > { %620 = vst [vmem:[%s923_s7 + $0xb8] sm:$0xff] %v588_v5  ;;  %v570_v6 = vsel %vm506_vm14, %v393_v62, %v538_v3  ;;  %v770_v8 = vpop.f32.mrb[8].mxu0  ;;  %v786_v9 = vpop.f32.mrb[8].mxu1 }
 0x10a   : > { %v586_v7 = vsel %vm522_vm15, %v457_v63, %v554_v4  ;;  %602 = vst [vmem:[%s923_s7 + $0x28] sm:$0xff] %v570_v6  ;;  %vm511_vm0 = vcmp.gt.f32.partialorder %v770_v8, 0.0  ;;  %v543_v10 = vmul.f32 0.2, %v770_v8  ;;  %vm527_vm1 = vcmp.gt.f32.partialorder %v786_v9, 0.0  ;;  %v406_v12 = vpop.f32.mrb[9].mxu0 }
 0x10b   : > { %618 = vst [vmem:[%s923_s7 + $0xa8] sm:$0xff] %v586_v7  ;;  %v559_v11 = vmul.f32 0.2, %v786_v9  ;;  %v470_v13 = vpop.f32.mrb[9].mxu1  ;;  %vm509_vm2 = vcmp.gt.f32.partialorder %v406_v12, 0.0  ;;  %v771_v17 = vpop.f32.mrb[10].mxu0 }
 0x10c   : > { %v575_v14 = vsel %vm511_vm0, %v770_v8, %v543_v10  ;;  %v541_v16 = vmul.f32 0.2, %v406_v12  ;;  %v787_v18 = vpop.f32.mrb[10].mxu1  ;;  %vm525_vm3 = vcmp.gt.f32.partialorder %v470_v13, 0.0  ;;  %v557_v19 = vmul.f32 0.2, %v470_v13 }
 0x10d   : > { %v591_v15 = vsel %vm527_vm1, %v786_v9, %v559_v11  ;;  %607 = vst [vmem:[%s923_s7 + $0x50] sm:$0xff] %v575_v14  ;;  %vm512_vm4 = vcmp.gt.f32.partialorder %v771_v17, 0.0  ;;  %v544_v20 = vmul.f32 0.2, %v771_v17  ;;  %vm528_vm5 = vcmp.gt.f32.partialorder %v787_v18, 0.0  ;;  %v409_v23 = vpop.f32.mrb[11].mxu0 }
 0x10e   : > { %623 = vst [vmem:[%s923_s7 + $0xd0] sm:$0xff] %v591_v15  ;;  %v573_v21 = vsel %vm509_vm2, %v406_v12, %v541_v16  ;;  %v560_v22 = vmul.f32 0.2, %v787_v18  ;;  %v473_v24 = vpop.f32.mrb[11].mxu1  ;;  %v589_v25 = vsel %vm525_vm3, %v470_v13, %v557_v19  ;;  %vm510_vm6 = vcmp.gt.f32.partialorder %v409_v23, 0.0 }
 0x10f   : > { %605 = vst [vmem:[%s923_s7 + $0x40] sm:$0xff] %v573_v21  ;;  %v576_v26 = vsel %vm512_vm4, %v771_v17, %v544_v20  ;;  %v542_v27 = vmul.f32 0.2, %v409_v23  ;;  %621 = vst [vmem:[%s923_s7 + $0xc0] sm:$0xff] %v589_v25  ;;  %vm526_vm7 = vcmp.gt.f32.partialorder %v473_v24, 0.0 }
 0x110   : > { %608 = vst [vmem:[%s923_s7 + $0x58] sm:$0xff] %v576_v26  ;;  %v592_v28 = vsel %vm528_vm5, %v787_v18, %v560_v22  ;;  %v558_v29 = vmul.f32 0.2, %v473_v24 }
 0x111   : > { %624 = vst [vmem:[%s923_s7 + $0xd8] sm:$0xff] %v592_v28  ;;  %v574_v30 = vsel %vm510_vm6, %v409_v23, %v542_v27  ;;  %v774_v31 = vpop.f32.mrb[12].mxu0  ;;  %v790_v32 = vpop.f32.mrb[12].mxu1 }
 0x112   : > { %606 = vst [vmem:[%s923_s7 + $0x48] sm:$0xff] %v574_v30  ;;  %v590_v33 = vsel %vm526_vm7, %v473_v24, %v558_v29  ;;  %vm515_vm8 = vcmp.gt.f32.partialorder %v774_v31, 0.0  ;;  %v547_v34 = vmul.f32 0.2, %v774_v31  ;;  %vm531_vm9 = vcmp.gt.f32.partialorder %v790_v32, 0.0  ;;  %v422_v35 = vpop.f32.mrb[13].mxu0 }
 0x113   : > { %v486_v36 = vpop.f32.mrb[13].mxu1  ;;  %622 = vst [vmem:[%s923_s7 + $0xc8] sm:$0xff] %v590_v33  ;;  %v563_v37 = vmul.f32 0.2, %v790_v32  ;;  %vm513_vm10 = vcmp.gt.f32.partialorder %v422_v35, 0.0  ;;  %v775_v41 = vpop.f32.mrb[14].mxu0 }
 0x114   : > { %v545_v38 = vmul.f32 0.2, %v422_v35  ;;  %vm529_vm11 = vcmp.gt.f32.partialorder %v486_v36, 0.0  ;;  %v579_v39 = vsel %vm515_vm8, %v774_v31, %v547_v34  ;;  %v561_v40 = vmul.f32 0.2, %v486_v36  ;;  %v791_v42 = vpop.f32.mrb[14].mxu1 }
 0x115   : > { %611 = vst [vmem:[%s923_s7 + $0x70] sm:$0xff] %v579_v39  ;;  %v595_v43 = vsel %vm531_vm9, %v790_v32, %v563_v37  ;;  %vm516_vm12 = vcmp.gt.f32.partialorder %v775_v41, 0.0  ;;  %v548_v45 = vmul.f32 0.2, %v775_v41  ;;  %v425_v46 = vpop.f32.mrb[15].mxu0  ;;  %v489_v47 = vpop.f32.mrb[15].mxu1 }
 0x116   : > { %v577_v44 = vsel %vm513_vm10, %v422_v35, %v545_v38  ;;  %627 = vst [vmem:[%s923_s7 + $0xf0] sm:$0xff] %v595_v43  ;;  %v593_v48 = vsel %vm529_vm11, %v486_v36, %v561_v40  ;;  %vm532_vm13 = vcmp.gt.f32.partialorder %v791_v42, 0.0  ;;  %v564_v49 = vmul.f32 0.2, %v791_v42 }
 0x117   : > { %609 = vst [vmem:[%s923_s7 + $0x60] sm:$0xff] %v577_v44  ;;  %vm514_vm14 = vcmp.gt.f32.partialorder %v425_v46, 0.0  ;;  %625 = vst [vmem:[%s923_s7 + $0xe0] sm:$0xff] %v593_v48  ;;  %v580_v50 = vsel %vm516_vm12, %v775_v41, %v548_v45  ;;  %v546_v51 = vmul.f32 0.2, %v425_v46  ;;  %vm530_vm15 = vcmp.gt.f32.partialorder %v489_v47, 0.0 }
 0x118   : > { %v562_v52 = vmul.f32 0.2, %v489_v47  ;;  %612 = vst [vmem:[%s923_s7 + $0x78] sm:$0xff] %v580_v50  ;;  %v596_v53 = vsel %vm532_vm13, %v791_v42, %v564_v49 }
 0x119   : > { %628 = vst [vmem:[%s923_s7 + $0xf8] sm:$0xff] %v596_v53  ;;  %v578_v54 = vsel %vm514_vm14, %v425_v46, %v546_v51 }
 0x11a   : > { %v594_v55 = vsel %vm530_vm15, %v489_v47, %v562_v52  ;;  %610 = vst [vmem:[%s923_s7 + $0x68] sm:$0xff] %v578_v54 }
 0x11b   : > { %626 = vst [vmem:[%s923_s7 + $0xe8] sm:$0xff] %v594_v55 }
 0x11c PF: > { %s12_s9 = sadd.s32 1, %s846_s9  }
 0x11d   : > { %p9_p4 = scmp.ge.s32.totalorder %s12_s9, 10  }
 0x11f   :  { %11 = sbr.rel (!%p9_p4) target bundleno = 1 (0x1), region = 58 }

// kernel: discriminator_forward.9
= control target key start
LH: loop header
LB: loop body
LE: loop exit
PB: predicated region body
PF: predicated region fallthrough
CT: control target
= control target key end

     0   :  { %s924_s12 = smov 0   ;;  %s1112_s0 = inlined_call_operand.vmem [shape: bf16[512,128], index: 0, kind: input, shape index: {}]   ;;  %s1113_s1 = inlined_call_operand.vmem [shape: bf16[128,128], index: 1, kind: input, shape index: {}]   ;;  %s1114_s2 = inlined_call_operand.vmem [shape: f32[512,128], index: 2, kind: output, shape index: {0}]   ;;  %s1115_s3 = inlined_call_operand.vmem [shape: f32[8,128], index: 3, kind: output, shape index: {1}]  }
   0x1 LB: > { %s738_s13 = sadd.s32 4294967295, %s901_s12   ;;  %p742_p0 = scmp.ge.s32.totalorder %s901_s12, 1  ;;  %s901_s12 = sphi %s924_s12, %s14_s12  }
   0x2   : > { %p136_p1 = scmp.lt.s32.totalorder %s901_s12, 3 }
   0x4   : > { %p137_p2 = pnand %p742_p0, %p136_p1 }
   0x5   : > { %v871_v0 = vld [vmem:[%s1113_s1] sm:$0xff] (!%p137_p2)   ;;  %s743_s16 = sshll.u32 (!%p137_p2), %s738_s13, 5  ;;  %v872_v1 = vld [vmem:[%s1113_s1 + $0x8] sm:$0xff] (!%p137_p2)   ;;  %v873_v2 = vld [vmem:[%s1113_s1 + $0x10] sm:$0xff] (!%p137_p2)   ;;  %vm664_vm0 = vcmask (!%p137_p2), 1040384   ;;  %vm666_vm1 = vcmask (!%p137_p2), 1041408  }
   0x6   : > { %140 = sbr.rel (%p137_p2) target bundleno = 335 (0x14f), region = 28  ;;  %p161_p3 = scmp.lt.s32.totalorder (!%p137_p2), %s743_s16, 63  ;;  %798 = vmatprep.subr.bf16.mxu0 (!%p137_p2), %v871_v0  ;;  %846 = vmatprep.subr.bf16.mxu1 (!%p137_p2), %v871_v0  ;;  %v874_v3 = vld [vmem:[%s1113_s1 + $0x18] sm:$0xff] (!%p137_p2)   ;;  %v875_v5 = vld [vmem:[%s1113_s1 + $0x20] sm:$0xff] (!%p137_p2)   ;;  %v876_v6 = vld [vmem:[%s1113_s1 + $0x28] sm:$0xff] (!%p137_p2)  }
   0x7   : > { %799 = vmatpush3.bf16.msra.mxu0 (!%p137_p2), %v871_v0  ;;  %854 = vmatpush3.bf16.msra.mxu1 (!%p137_p2), %v871_v0  ;;  %v877_v8 = vld [vmem:[%s1113_s1 + $0x30] sm:$0xff] (!%p137_p2)   ;;  %v878_v9 = vld [vmem:[%s1113_s1 + $0x38] sm:$0xff] (!%p137_p2)   ;;  %p771_p4 = scmp.ne.s32.totalorder (!%p137_p2), %s738_s13, 0 }
   0x8   : > { %800 = vmatprep.subr.bf16.mxu0 (!%p137_p2), %v872_v1  ;;  %847 = vmatprep.subr.bf16.mxu1 (!%p137_p2), %v872_v1 }
   0xb   : > { %801 = vmatpush3.bf16.msra.mxu0 (!%p137_p2), %v872_v1  ;;  %855 = vmatpush3.bf16.msra.mxu1 (!%p137_p2), %v872_v1 }
   0xc   : > { %802 = vmatprep.subr.bf16.mxu0 (!%p137_p2), %v873_v2  ;;  %848 = vmatprep.subr.bf16.mxu1 (!%p137_p2), %v873_v2 }
   0xd   : > { %s1117_s16 = smov (!%p161_p3, %s743_s16), 63 }
   0xe   : > { %s744_s21 = sshll.u32 %s1117_s16, 2  ;;  %s746_s8 = sshll.u32 %s1117_s16, 3 }
   0xf   : > { %s949_s24 = scalar_lea.vmem %s1112_s0, %s744_s21  ;;  %803 = vmatpush3.bf16.msra.mxu0 %v873_v2  ;;  %856 = vmatpush3.bf16.msra.mxu1 %v873_v2  ;;  %s986_s11 = scalar_lea.vmem %s1114_s2, %s746_s8 }
  0x10   : > { %v879_v4 = vld [vmem:[%s949_s24] sm:$0xff]   ;;  %804 = vmatprep.subr.bf16.mxu0 %v874_v3  ;;  %849 = vmatprep.subr.bf16.mxu1 %v874_v3  ;;  %v880_v10 = vld [vmem:[%s949_s24 + $0x8] sm:$0xff]   ;;  %v881_v12 = vld [vmem:[%s949_s24 + $0x10] sm:$0xff]  }
  0x11   : > { %814 = vmatprep.mubr.bf16.mxu0 %v879_v4  ;;  %v887_v7 = vld [vmem:[%s949_s24 + $0x40] sm:$0xff]   ;;  %v888_v11 = vld [vmem:[%s949_s24 + $0x48] sm:$0xff]   ;;  %v889_v13 = vld [vmem:[%s949_s24 + $0x50] sm:$0xff]  }
  0x12   : > { %830 = vmatprep.mubr.bf16.mxu1 %v887_v7  ;;  %v882_v14 = vld [vmem:[%s949_s24 + $0x18] sm:$0xff]   ;;  %v883_v16 = vld [vmem:[%s949_s24 + $0x20] sm:$0xff]   ;;  %v884_v18 = vld [vmem:[%s949_s24 + $0x28] sm:$0xff]  }
  0x13   : > { %805 = vmatpush3.bf16.msra.mxu0 %v874_v3  ;;  %857 = vmatpush3.bf16.msra.mxu1 %v874_v3  ;;  %v890_v15 = vld [vmem:[%s949_s24 + $0x58] sm:$0xff]   ;;  %v891_v17 = vld [vmem:[%s949_s24 + $0x60] sm:$0xff]   ;;  %v892_v19 = vld [vmem:[%s949_s24 + $0x68] sm:$0xff]  }
  0x14   : > { %806 = vmatprep.subr.bf16.mxu0 %v875_v5  ;;  %850 = vmatprep.subr.bf16.mxu1 %v875_v5  ;;  %v885_v20 = vld [vmem:[%s949_s24 + $0x30] sm:$0xff]   ;;  %v886_v22 = vld [vmem:[%s949_s24 + $0x38] sm:$0xff]  }
  0x15   : > { %v893_v21 = vld [vmem:[%s949_s24 + $0x70] sm:$0xff]   ;;  %v894_v23 = vld [vmem:[%s949_s24 + $0x78] sm:$0xff]  }
  0x17   : > { %807 = vmatpush3.bf16.msra.mxu0 %v875_v5  ;;  %858 = vmatpush3.bf16.msra.mxu1 %v875_v5 }
  0x18   : > { %808 = vmatprep.subr.bf16.mxu0 %v876_v6  ;;  %851 = vmatprep.subr.bf16.mxu1 %v876_v6 }
  0x1b   : > { %809 = vmatpush3.bf16.msra.mxu0 %v876_v6  ;;  %859 = vmatpush3.bf16.msra.mxu1 %v876_v6 }
  0x1c   : > { %810 = vmatprep.subr.bf16.mxu0 %v877_v8  ;;  %852 = vmatprep.subr.bf16.mxu1 %v877_v8 }
  0x1f   : > { %811 = vmatpush3.bf16.msra.mxu0 %v877_v8  ;;  %860 = vmatpush3.bf16.msra.mxu1 %v877_v8 }
  0x20   : > { %812 = vmatprep.subr.bf16.mxu0 %v878_v9  ;;  %853 = vmatprep.subr.bf16.mxu1 %v878_v9 }
  0x23   : > { %813 = vmatpush3.bf16.msra.mxu0 %v878_v9  ;;  %861 = vmatpush3.bf16.msra.mxu1 %v878_v9 }
  0x26   : > { %815 = vmatmul.mubr.bf16.vlgmr.msra.gmra.mrb[0].mxu0 %v880_v10  ;;  %831 = vmatmul.mubr.bf16.vlgmr.msra.gmra.mrb[0].mxu1 %v888_v11 }
  0x27   : > { %818 = vmatprep.mubr.bf16.mxu0 %v881_v12  ;;  %834 = vmatprep.mubr.bf16.mxu1 %v889_v13 }
  0x2e   : > { %819 = vmatmul.mubr.bf16.gmra.mrb[4].mxu0 %v882_v14  ;;  %835 = vmatmul.mubr.bf16.gmra.mrb[4].mxu1 %v890_v15 }
  0x2f   : > { %822 = vmatprep.mubr.bf16.mxu0 %v883_v16  ;;  %838 = vmatprep.mubr.bf16.mxu1 %v891_v17 }
  0x36   : > { %823 = vmatmul.mubr.bf16.gmra.mrb[8].mxu0 %v884_v18  ;;  %839 = vmatmul.mubr.bf16.gmra.mrb[8].mxu1 %v892_v19 }
  0x37   : > { %826 = vmatprep.mubr.bf16.mxu0 %v885_v20  ;;  %842 = vmatprep.mubr.bf16.mxu1 %v893_v21 }
  0x3e   : > { %827 = vmatmul.mubr.bf16.gmra.mrb[12].mxu0 %v886_v22  ;;  %843 = vmatmul.mubr.bf16.gmra.mrb[12].mxu1 %v894_v23 }
  0xf9   : > { %v816_v24 = vpop.f32.mrb[0].mxu0  ;;  %v988_v25 = vpop.f32.mrb[0].mxu1 }
  0xfa   : > { %528 = vst [vmem:[%s986_s11 + $0x10] sm:$0xff] %v816_v24  ;;  %v399_v26 = vpop.f32.mrb[1].mxu0  ;;  %544 = vst [vmem:[%s986_s11 + $0x90] sm:$0xff] %v988_v25  ;;  %v993_v27 = vpop.f32.mrb[1].mxu1  ;;  %v597_v35 = vmul.f32 %v816_v24, %v816_v24 }
  0xfb   : > { %526 = vst [vmem:[%s986_s11] sm:$0xff] %v399_v26  ;;  %v817_v28 = vpop.f32.mrb[2].mxu0  ;;  %542 = vst [vmem:[%s986_s11 + $0x80] sm:$0xff] %v993_v27  ;;  %v998_v29 = vpop.f32.mrb[2].mxu1  ;;  %v595_v32 = vmul.f32 %v399_v26, %v399_v26 }
  0xfc   : > { %529 = vst [vmem:[%s986_s11 + $0x18] sm:$0xff] %v817_v28  ;;  %v402_v30 = vpop.f32.mrb[3].mxu0  ;;  %545 = vst [vmem:[%s986_s11 + $0x98] sm:$0xff] %v998_v29  ;;  %v1003_v31 = vpop.f32.mrb[3].mxu1  ;;  %v598_v38 = vmul.f32 %v817_v28, %v817_v28 }
  0xfd   : > { %527 = vst [vmem:[%s986_s11 + $0x8] sm:$0xff] %v402_v30  ;;  %v558_v33 = vadd.f32 %v402_v30, %v399_v26  ;;  %v596_v34 = vmul.f32 %v402_v30, %v402_v30  ;;  %543 = vst [vmem:[%s986_s11 + $0x88] sm:$0xff] %v1003_v31 }
  0xff   : > { %v559_v36 = vadd.f32 %v816_v24, %v558_v33  ;;  %v627_v37 = vadd.f32 %v596_v34, %v595_v32 }
 0x101   : > { %v628_v39 = vadd.f32 %v627_v37, %v597_v35  ;;  %v820_v40 = vpop.f32.mrb[4].mxu0  ;;  %v560_v41 = vadd.f32 %v817_v28, %v559_v36  ;;  %v1008_v42 = vpop.f32.mrb[4].mxu1 }
 0x102   : > { %532 = vst [vmem:[%s986_s11 + $0x30] sm:$0xff] %v820_v40  ;;  %v415_v43 = vpop.f32.mrb[5].mxu0  ;;  %548 = vst [vmem:[%s986_s11 + $0xb0] sm:$0xff] %v1008_v42  ;;  %v1013_v44 = vpop.f32.mrb[5].mxu1  ;;  %v601_v55 = vmul.f32 %v820_v40, %v820_v40 }
 0x103   : > { %530 = vst [vmem:[%s986_s11 + $0x20] sm:$0xff] %v415_v43  ;;  %v561_v45 = vadd.f32 %v560_v41, %v415_v43  ;;  %v599_v46 = vmul.f32 %v415_v43, %v415_v43  ;;  %v629_v47 = vadd.f32 %v628_v39, %v598_v38  ;;  %v821_v48 = vpop.f32.mrb[6].mxu0  ;;  %546 = vst [vmem:[%s986_s11 + $0xa0] sm:$0xff] %v1013_v44  ;;  %v1018_v49 = vpop.f32.mrb[6].mxu1 }
 0x104   : > { %533 = vst [vmem:[%s986_s11 + $0x38] sm:$0xff] %v821_v48  ;;  %v418_v50 = vpop.f32.mrb[7].mxu0  ;;  %549 = vst [vmem:[%s986_s11 + $0xb8] sm:$0xff] %v1018_v49  ;;  %v1023_v51 = vpop.f32.mrb[7].mxu1  ;;  %v602_v58 = vmul.f32 %v821_v48, %v821_v48  ;;  %v611_v41 = vmul.f32 %v993_v27, %v993_v27 }
 0x105   : > { %v630_v52 = vadd.f32 %v629_v47, %v599_v46  ;;  %531 = vst [vmem:[%s986_s11 + $0x28] sm:$0xff] %v418_v50  ;;  %v562_v53 = vadd.f32 %v561_v45, %v418_v50  ;;  %v600_v54 = vmul.f32 %v418_v50, %v418_v50  ;;  %547 = vst [vmem:[%s986_s11 + $0xa8] sm:$0xff] %v1023_v51 }
 0x106   : > { %v613_v50 = vmul.f32 %v988_v25, %v988_v25 }
 0x107   : > { %v563_v56 = vadd.f32 %v820_v40, %v562_v53  ;;  %v631_v57 = vadd.f32 %v630_v52, %v600_v54  ;;  %v614_v54 = vmul.f32 %v998_v29, %v998_v29 }
 0x109   : > { %v632_v59 = vadd.f32 %v631_v57, %v601_v55  ;;  %v824_v60 = vpop.f32.mrb[8].mxu0  ;;  %v564_v61 = vadd.f32 %v821_v48, %v563_v56  ;;  %v1028_v62 = vpop.f32.mrb[8].mxu1  ;;  %v612_v48 = vmul.f32 %v1003_v31, %v1003_v31 }
 0x10a   : > { %536 = vst [vmem:[%s986_s11 + $0x50] sm:$0xff] %v824_v60  ;;  %v431_v63 = vpop.f32.mrb[9].mxu0  ;;  %552 = vst [vmem:[%s986_s11 + $0xd0] sm:$0xff] %v1028_v62  ;;  %v1033_v0 = vpop.f32.mrb[9].mxu1  ;;  %v605_v11 = vmul.f32 %v824_v60, %v824_v60 }
 0x10b   : > { %534 = vst [vmem:[%s986_s11 + $0x40] sm:$0xff] %v431_v63  ;;  %v565_v1 = vadd.f32 %v564_v61, %v431_v63  ;;  %v603_v2 = vmul.f32 %v431_v63, %v431_v63  ;;  %v633_v3 = vadd.f32 %v632_v59, %v602_v58  ;;  %v825_v4 = vpop.f32.mrb[10].mxu0  ;;  %550 = vst [vmem:[%s986_s11 + $0xc0] sm:$0xff] %v1033_v0  ;;  %v1038_v5 = vpop.f32.mrb[10].mxu1 }
 0x10c   : > { %537 = vst [vmem:[%s986_s11 + $0x58] sm:$0xff] %v825_v4  ;;  %v434_v6 = vpop.f32.mrb[11].mxu0  ;;  %553 = vst [vmem:[%s986_s11 + $0xd8] sm:$0xff] %v1038_v5  ;;  %v1043_v7 = vpop.f32.mrb[11].mxu1  ;;  %v606_v14 = vmul.f32 %v825_v4, %v825_v4 }
 0x10d   : > { %v634_v8 = vadd.f32 %v633_v3, %v603_v2  ;;  %535 = vst [vmem:[%s986_s11 + $0x48] sm:$0xff] %v434_v6  ;;  %v566_v9 = vadd.f32 %v565_v1, %v434_v6  ;;  %v604_v10 = vmul.f32 %v434_v6, %v434_v6  ;;  %551 = vst [vmem:[%s986_s11 + $0xc8] sm:$0xff] %v1043_v7 }
 0x10f   : > { %v567_v12 = vadd.f32 %v824_v60, %v566_v9  ;;  %v635_v13 = vadd.f32 %v634_v8, %v604_v10  ;;  %v616_v60 = vmul.f32 %v1023_v51, %v1023_v51  ;;  %v620_v8 = vmul.f32 %v1043_v7, %v1043_v7 }
 0x111   : > { %v636_v15 = vadd.f32 %v635_v13, %v605_v11  ;;  %v828_v16 = vpop.f32.mrb[12].mxu0  ;;  %v568_v17 = vadd.f32 %v825_v4, %v567_v12  ;;  %v1048_v18 = vpop.f32.mrb[12].mxu1 }
 0x112   : > { %540 = vst [vmem:[%s986_s11 + $0x70] sm:$0xff] %v828_v16  ;;  %v447_v19 = vpop.f32.mrb[13].mxu0  ;;  %556 = vst [vmem:[%s986_s11 + $0xf0] sm:$0xff] %v1048_v18  ;;  %v511_v20 = vpop.f32.mrb[13].mxu1  ;;  %v609_v35 = vmul.f32 %v828_v16, %v828_v16 }
 0x113   : > { %538 = vst [vmem:[%s986_s11 + $0x60] sm:$0xff] %v447_v19  ;;  %v569_v21 = vadd.f32 %v568_v17, %v447_v19  ;;  %v607_v22 = vmul.f32 %v447_v19, %v447_v19  ;;  %v637_v23 = vadd.f32 %v636_v15, %v606_v14  ;;  %v829_v24 = vpop.f32.mrb[14].mxu0  ;;  %554 = vst [vmem:[%s986_s11 + $0xe0] sm:$0xff] %v511_v20  ;;  %v845_v26 = vpop.f32.mrb[14].mxu1 }
 0x114   : > { %541 = vst [vmem:[%s986_s11 + $0x78] sm:$0xff] %v829_v24  ;;  %v450_v28 = vpop.f32.mrb[15].mxu0  ;;  %557 = vst [vmem:[%s986_s11 + $0xf8] sm:$0xff] %v845_v26  ;;  %v514_v30 = vpop.f32.mrb[15].mxu1  ;;  %v610_v38 = vmul.f32 %v829_v24, %v829_v24 }
 0x115   : > { %v638_v32 = vadd.f32 %v637_v23, %v607_v22  ;;  %539 = vst [vmem:[%s986_s11 + $0x68] sm:$0xff] %v450_v28  ;;  %v570_v33 = vadd.f32 %v569_v21, %v450_v28  ;;  %v608_v34 = vmul.f32 %v450_v28, %v450_v28  ;;  %555 = vst [vmem:[%s986_s11 + $0xe8] sm:$0xff] %v514_v30 }
 0x116   : > { %v624_v17 = vmul.f32 %v514_v30, %v514_v30 }
 0x117   : > { %v571_v36 = vadd.f32 %v828_v16, %v570_v33  ;;  %v639_v37 = vadd.f32 %v638_v32, %v608_v34 }
 0x119   : > { %v640_v39 = vadd.f32 %v639_v37, %v609_v35  ;;  %v572_v40 = vadd.f32 %v829_v24, %v571_v36 }
 0x11b   : > { %v573_v43 = vadd.f32 %v572_v40, %v993_v27  ;;  %v641_v45 = vadd.f32 %v640_v39, %v610_v38  ;;  %v615_v27 = vmul.f32 %v1013_v44, %v1013_v44 }
 0x11d   : > { %v642_v46 = vadd.f32 %v641_v45, %v611_v41  ;;  %v574_v47 = vadd.f32 %v573_v43, %v1003_v31 }
 0x11f   : > { %v575_v52 = vadd.f32 %v988_v25, %v574_v47  ;;  %v643_v53 = vadd.f32 %v642_v46, %v612_v48  ;;  %v617_v25 = vmul.f32 %v1008_v42, %v1008_v42 }
 0x121   : > { %v644_v55 = vadd.f32 %v643_v53, %v613_v50  ;;  %v576_v56 = vadd.f32 %v998_v29, %v575_v52  ;;  %v618_v29 = vmul.f32 %v1018_v49, %v1018_v49 }
 0x123   : > { %v577_v57 = vadd.f32 %v576_v56, %v1013_v44  ;;  %v645_v58 = vadd.f32 %v644_v55, %v614_v54  ;;  %v619_v44 = vmul.f32 %v1033_v0, %v1033_v0 }
 0x125   : > { %v646_v59 = vadd.f32 %v645_v58, %v615_v27  ;;  %v578_v31 = vadd.f32 %v577_v57, %v1023_v51 }
 0x127   : > { %v579_v61 = vadd.f32 %v1008_v42, %v578_v31  ;;  %v647_v63 = vadd.f32 %v646_v59, %v616_v60  ;;  %v621_v42 = vmul.f32 %v1028_v62, %v1028_v62 }
 0x129   : > { %v648_v1 = vadd.f32 %v647_v63, %v617_v25  ;;  %v580_v2 = vadd.f32 %v1018_v49, %v579_v61  ;;  %v622_v49 = vmul.f32 %v1038_v5, %v1038_v5 }
 0x12b   : > { %v581_v3 = vadd.f32 %v580_v2, %v1033_v0  ;;  %v649_v4 = vadd.f32 %v648_v1, %v618_v29  ;;  %v623_v0 = vmul.f32 %v511_v20, %v511_v20 }
 0x12d   : > { %v650_v6 = vadd.f32 %v649_v4, %v619_v44  ;;  %v582_v51 = vadd.f32 %v581_v3, %v1043_v7  ;;  %v625_v7 = vmul.f32 %v1048_v18, %v1048_v18 }
 0x12f   : > { %v583_v9 = vadd.f32 %v1028_v62, %v582_v51  ;;  %v651_v10 = vadd.f32 %v650_v6, %v620_v8  ;;  %v626_v62 = vmul.f32 %v845_v26, %v845_v26 }
 0x131   : > { %v652_v11 = vadd.f32 %v651_v10, %v621_v42  ;;  %v584_v12 = vadd.f32 %v1038_v5, %v583_v9 }
 0x133   : > { %v585_v13 = vadd.f32 %v584_v12, %v511_v20  ;;  %v653_v14 = vadd.f32 %v652_v11, %v622_v49 }
 0x135   : > { %v654_v15 = vadd.f32 %v653_v14, %v623_v0  ;;  %v586_v16 = vadd.f32 %v585_v13, %v514_v30 }
 0x137   : > { %v587_v19 = vadd.f32 %v1048_v18, %v586_v16  ;;  %v655_v21 = vadd.f32 %v654_v15, %v624_v17 }
 0x139   : > { %v588_v22 = vadd.f32 %v845_v26, %v587_v19  ;;  %v656_v23 = vadd.f32 %v655_v21, %v625_v7  ;;  %v903_v26 = vmov (!%p771_p4), 0.0  }
 0x13a   : > { %672 = vst [vmem:[%s1115_s3] sm:$0xff] (!%p771_p4), %v903_v26 }
 0x13b   : > { %v589_v24 = vrot.slane %v588_v22, 4  ;;  %v657_v28 = vadd.f32 %v656_v23, %v626_v62 }
 0x13d   : > { %v590_v32 = vadd.f32 %v589_v24, %v588_v22  ;;  %v658_v33 = vrot.slane %v657_v28, 4 }
 0x13f   : > { %v591_v5 = vrot.slane %v590_v32, 2  ;;  %v659_v34 = vadd.f32 %v658_v33, %v657_v28 }
 0x141   : > { %v592_v20 = vadd.f32 %v591_v5, %v590_v32  ;;  %v660_v35 = vrot.slane %v659_v34, 2 }
 0x143   : > { %v593_v36 = vrot.slane %v592_v20, 1  ;;  %v661_v37 = vadd.f32 %v660_v35, %v659_v34 }
 0x144   : > { %671 = sbr.rel (%p771_p4) target bundleno = 331 (0x14b), region = 32 }
 0x145   : > { %v662_v30 = vrot.slane %v661_v37, 1  ;;  %v594_v38 = vadd.f32 %v593_v36, %v592_v20 }
 0x147   : > { %v663_v39 = vadd.f32 %v662_v30, %v661_v37 }
 0x149   : > { %v665_v18 = vsel %vm664_vm0, %v594_v38, %v663_v39 }
 0x14a   : > { %v667_v40 = vsel %vm666_vm1, %v665_v18, 0.0 }
 0x14b PF: > { %v673_v41 = vld [vmem:[%s1115_s3] sm:$0xff] }
 0x14c   : > { %v674_v43 = vadd.f32 %v673_v41, %v667_v40 }
 0x14e   : > { %675 = vst [vmem:[%s1115_s3] sm:$0xff] %v674_v43 }
 0x14f PF: > { %s14_s12 = sadd.s32 1, %s901_s12  }
 0x150   : > { %p11_p5 = scmp.ge.s32.totalorder %s14_s12, 4  }
 0x152   :  { %13 = sbr.rel (!%p11_p5) target bundleno = 1 (0x1), region = 70 }

// kernel: discriminator_forward.10
= control target key start
LH: loop header
LB: loop body
LE: loop exit
PB: predicated region body
PF: predicated region fallthrough
CT: control target
= control target key end

     0   :  { %s481_s9 = smov 0   ;;  %s643_s0 = inlined_call_operand.vmem [shape: f32[512,128], index: 0, kind: input, shape index: {}]   ;;  %s644_s1 = inlined_call_operand.vmem [shape: f32[8,128], index: 1, kind: input, shape index: {}]   ;;  %s645_s2 = inlined_call_operand.vmem [shape: f32[512,128], index: 2, kind: output, shape index: {}]  }
   0x1 LB: > { %s437_s10 = sadd.s32 4294967295, %s464_s9   ;;  %p441_p0 = scmp.ge.s32.totalorder %s464_s9, 1  ;;  %s464_s9 = sphi %s481_s9, %s12_s9  }
   0x2   : > { %p113_p1 = scmp.lt.s32.totalorder %s464_s9, 3 }
   0x4   : > { %p114_p2 = pnand %p441_p0, %p113_p1 }
   0x5   : > { %s442_s11 = sshll.u32 (!%p114_p2), %s437_s10, 5  ;;  %v495_v0 = vld [vmem:[%s644_s1] ss:$0 sm:$0xff] (!%p114_p2)  ;;  %v505_v1 = vld [vmem:[%s644_s1 + $0x1] ss:$0 sm:$0xff] (!%p114_p2) }
   0x6   : > { %117 = sbr.rel (%p114_p2) target bundleno = 62 (0x3e), region = 28  ;;  %p136_p3 = scmp.lt.s32.totalorder (!%p114_p2), %s442_s11, 63 }
   0xd   : > { %s647_s11 = smov (!%p136_p3, %s442_s11), 63 }
   0xe   : > { %s443_s12 = sshll.u32 %s647_s11, 3 }
   0xf   : > { %s500_s17 = scalar_lea.vmem %s643_s0, %s443_s12  ;;  %s533_s22 = scalar_lea.vmem %s645_s2, %s443_s12 }
  0x10   : > { %v147_v2 = vld [vmem:[%s500_s17] sm:$0xff]  ;;  %v148_v3 = vld [vmem:[%s500_s17 + $0x8] sm:$0xff]  ;;  %v149_v4 = vld [vmem:[%s500_s17 + $0x10] sm:$0xff] }
  0x11   : > { %v184_v5 = vmul.f32 %v495_v0, %v147_v2  ;;  %v185_v6 = vmul.f32 %v495_v0, %v148_v3  ;;  %v186_v7 = vmul.f32 %v495_v0, %v149_v4  ;;  %v150_v8 = vld [vmem:[%s500_s17 + $0x18] sm:$0xff]  ;;  %v151_v9 = vld [vmem:[%s500_s17 + $0x20] sm:$0xff]  ;;  %v152_v10 = vld [vmem:[%s500_s17 + $0x28] sm:$0xff] }
  0x12   : > { %v187_v11 = vmul.f32 %v495_v0, %v150_v8  ;;  %v188_v12 = vmul.f32 %v495_v0, %v151_v9  ;;  %v189_v13 = vmul.f32 %v495_v0, %v152_v10  ;;  %v153_v14 = vld [vmem:[%s500_s17 + $0x30] sm:$0xff]  ;;  %v154_v15 = vld [vmem:[%s500_s17 + $0x38] sm:$0xff]  ;;  %v155_v24 = vld [vmem:[%s500_s17 + $0x40] sm:$0xff] }
  0x13   : > { %v221_v16 = vadd.f32 %v505_v1, %v184_v5  ;;  %v222_v17 = vadd.f32 %v505_v1, %v185_v6  ;;  %v223_v18 = vadd.f32 %v505_v1, %v186_v7  ;;  %v190_v19 = vmul.f32 %v495_v0, %v153_v14  ;;  %v156_v32 = vld [vmem:[%s500_s17 + $0x48] sm:$0xff]  ;;  %v157_v33 = vld [vmem:[%s500_s17 + $0x50] sm:$0xff]  ;;  %v158_v34 = vld [vmem:[%s500_s17 + $0x58] sm:$0xff] }
  0x14   : > { %v224_v20 = vadd.f32 %v505_v1, %v187_v11  ;;  %v225_v21 = vadd.f32 %v505_v1, %v188_v12  ;;  %v226_v22 = vadd.f32 %v505_v1, %v189_v13  ;;  %v191_v23 = vmul.f32 %v495_v0, %v154_v15  ;;  %v159_v46 = vld [vmem:[%s500_s17 + $0x60] sm:$0xff]  ;;  %v160_v47 = vld [vmem:[%s500_s17 + $0x68] sm:$0xff]  ;;  %v161_v58 = vld [vmem:[%s500_s17 + $0x70] sm:$0xff] }
  0x15   : > { %vm253_vm0 = vcmp.gt.f32.partialorder %v221_v16, 0.0  ;;  %v285_v25 = vmul.f32 0.2, %v221_v16  ;;  %vm254_vm1 = vcmp.gt.f32.partialorder %v222_v17, 0.0  ;;  %v286_v26 = vmul.f32 0.2, %v222_v17 }
  0x16   : > { %vm255_vm2 = vcmp.gt.f32.partialorder %v223_v18, 0.0  ;;  %v287_v27 = vmul.f32 0.2, %v223_v18  ;;  %vm256_vm3 = vcmp.gt.f32.partialorder %v224_v20, 0.0  ;;  %v288_v28 = vmul.f32 0.2, %v224_v20 }
  0x17   : > { %v317_v29 = vsel %vm253_vm0, %v221_v16, %v285_v25  ;;  %v318_v30 = vsel %vm254_vm1, %v222_v17, %v286_v26  ;;  %vm257_vm4 = vcmp.gt.f32.partialorder %v225_v21, 0.0  ;;  %v289_v31 = vmul.f32 0.2, %v225_v21  ;;  %v162_v59 = vld [vmem:[%s500_s17 + $0x78] sm:$0xff]  ;;  %v163_v6 = vld [vmem:[%s500_s17 + $0x80] sm:$0xff]  ;;  %v164_v7 = vld [vmem:[%s500_s17 + $0x88] sm:$0xff] }
  0x18   : > { %349 = vst [vmem:[%s533_s22] sm:$0xff] %v317_v29  ;;  %350 = vst [vmem:[%s533_s22 + $0x8] sm:$0xff] %v318_v30  ;;  %v319_v35 = vsel %vm255_vm2, %v223_v18, %v287_v27  ;;  %v320_v36 = vsel %vm256_vm3, %v224_v20, %v288_v28  ;;  %vm258_vm5 = vcmp.gt.f32.partialorder %v226_v22, 0.0  ;;  %v290_v37 = vmul.f32 0.2, %v226_v22  ;;  %v165_v12 = vld [vmem:[%s500_s17 + $0x90] sm:$0xff]  ;;  %v166_v13 = vld [vmem:[%s500_s17 + $0x98] sm:$0xff] }
  0x19   : > { %351 = vst [vmem:[%s533_s22 + $0x10] sm:$0xff] %v319_v35  ;;  %352 = vst [vmem:[%s533_s22 + $0x18] sm:$0xff] %v320_v36  ;;  %v321_v38 = vsel %vm257_vm4, %v225_v21, %v289_v31  ;;  %v227_v39 = vadd.f32 %v505_v1, %v190_v19  ;;  %v228_v40 = vadd.f32 %v505_v1, %v191_v23  ;;  %v168_v25 = vld [vmem:[%s500_s17 + $0xa8] sm:$0xff]  ;;  %v169_v36 = vld [vmem:[%s500_s17 + $0xb0] sm:$0xff] }
  0x1a   : > { %v192_v41 = vmul.f32 %v495_v0, %v155_v24  ;;  %353 = vst [vmem:[%s533_s22 + $0x20] sm:$0xff] %v321_v38  ;;  %v322_v42 = vsel %vm258_vm5, %v226_v22, %v290_v37  ;;  %v193_v43 = vmul.f32 %v495_v0, %v156_v32  ;;  %v194_v44 = vmul.f32 %v495_v0, %v157_v33  ;;  %v167_v24 = vld [vmem:[%s500_s17 + $0xa0] sm:$0xff]  ;;  %v170_v37 = vld [vmem:[%s500_s17 + $0xb8] sm:$0xff] }
  0x1b   : > { %v195_v45 = vmul.f32 %v495_v0, %v158_v34  ;;  %354 = vst [vmem:[%s533_s22 + $0x28] sm:$0xff] %v322_v42  ;;  %vm259_vm6 = vcmp.gt.f32.partialorder %v227_v39, 0.0  ;;  %v291_v48 = vmul.f32 0.2, %v227_v39  ;;  %vm260_vm7 = vcmp.gt.f32.partialorder %v228_v40, 0.0 }
  0x1c   : > { %v292_v49 = vmul.f32 0.2, %v228_v40  ;;  %v229_v50 = vadd.f32 %v505_v1, %v192_v41  ;;  %v230_v51 = vadd.f32 %v505_v1, %v193_v43  ;;  %v231_v52 = vadd.f32 %v505_v1, %v194_v44 }
  0x1d   : > { %v232_v53 = vadd.f32 %v505_v1, %v195_v45  ;;  %v323_v54 = vsel %vm259_vm6, %v227_v39, %v291_v48  ;;  %v196_v56 = vmul.f32 %v495_v0, %v159_v46  ;;  %v197_v57 = vmul.f32 %v495_v0, %v160_v47  ;;  %v171_v46 = vld [vmem:[%s500_s17 + $0xc0] sm:$0xff]  ;;  %v172_v47 = vld [vmem:[%s500_s17 + $0xc8] sm:$0xff] }
  0x1e   : > { %v324_v55 = vsel %vm260_vm7, %v228_v40, %v292_v49  ;;  %355 = vst [vmem:[%s533_s22 + $0x30] sm:$0xff] %v323_v54  ;;  %vm261_vm8 = vcmp.gt.f32.partialorder %v229_v50, 0.0  ;;  %v293_v60 = vmul.f32 0.2, %v229_v50  ;;  %vm262_vm9 = vcmp.gt.f32.partialorder %v230_v51, 0.0 }
  0x1f   : > { %356 = vst [vmem:[%s533_s22 + $0x38] sm:$0xff] %v324_v55  ;;  %v294_v61 = vmul.f32 0.2, %v230_v51  ;;  %vm263_vm10 = vcmp.gt.f32.partialorder %v231_v52, 0.0  ;;  %v295_v62 = vmul.f32 0.2, %v231_v52  ;;  %v233_v4 = vadd.f32 %v505_v1, %v196_v56 }
  0x20   : > { %vm264_vm11 = vcmp.gt.f32.partialorder %v232_v53, 0.0  ;;  %v296_v63 = vmul.f32 0.2, %v232_v53  ;;  %v325_v2 = vsel %vm261_vm8, %v229_v50, %v293_v60  ;;  %v234_v5 = vadd.f32 %v505_v1, %v197_v57 }
  0x21   : > { %v326_v3 = vsel %vm262_vm9, %v230_v51, %v294_v61  ;;  %357 = vst [vmem:[%s533_s22 + $0x40] sm:$0xff] %v325_v2  ;;  %v327_v8 = vsel %vm263_vm10, %v231_v52, %v295_v62  ;;  %v198_v10 = vmul.f32 %v495_v0, %v161_v58  ;;  %v199_v11 = vmul.f32 %v495_v0, %v162_v59  ;;  %v173_v52 = vld [vmem:[%s500_s17 + $0xd0] sm:$0xff]  ;;  %v175_v2 = vld [vmem:[%s500_s17 + $0xe0] sm:$0xff] }
  0x22   : > { %358 = vst [vmem:[%s533_s22 + $0x48] sm:$0xff] %v326_v3  ;;  %v328_v9 = vsel %vm264_vm11, %v232_v53, %v296_v63  ;;  %359 = vst [vmem:[%s533_s22 + $0x50] sm:$0xff] %v327_v8  ;;  %vm265_vm12 = vcmp.gt.f32.partialorder %v233_v4, 0.0  ;;  %v297_v14 = vmul.f32 0.2, %v233_v4  ;;  %vm266_vm13 = vcmp.gt.f32.partialorder %v234_v5, 0.0 }
  0x23   : > { %360 = vst [vmem:[%s533_s22 + $0x58] sm:$0xff] %v328_v9  ;;  %v298_v15 = vmul.f32 0.2, %v234_v5  ;;  %v235_v16 = vadd.f32 %v505_v1, %v198_v10  ;;  %v236_v17 = vadd.f32 %v505_v1, %v199_v11  ;;  %v200_v18 = vmul.f32 %v495_v0, %v163_v6  ;;  %v174_v53 = vld [vmem:[%s500_s17 + $0xd8] sm:$0xff]  ;;  %v176_v3 = vld [vmem:[%s500_s17 + $0xe8] sm:$0xff] }
  0x24   : > { %v201_v19 = vmul.f32 %v495_v0, %v164_v7  ;;  %v329_v20 = vsel %vm265_vm12, %v233_v4, %v297_v14  ;;  %v202_v22 = vmul.f32 %v495_v0, %v165_v12  ;;  %v203_v23 = vmul.f32 %v495_v0, %v166_v13  ;;  %v177_v14 = vld [vmem:[%s500_s17 + $0xf0] sm:$0xff] }
  0x25   : > { %v330_v21 = vsel %vm266_vm13, %v234_v5, %v298_v15  ;;  %361 = vst [vmem:[%s533_s22 + $0x60] sm:$0xff] %v329_v20  ;;  %vm267_vm14 = vcmp.gt.f32.partialorder %v235_v16, 0.0  ;;  %v299_v26 = vmul.f32 0.2, %v235_v16  ;;  %vm268_vm15 = vcmp.gt.f32.partialorder %v236_v17, 0.0  ;;  %v178_v15 = vld [vmem:[%s500_s17 + $0xf8] sm:$0xff] }
  0x26   : > { %362 = vst [vmem:[%s533_s22 + $0x68] sm:$0xff] %v330_v21  ;;  %v300_v27 = vmul.f32 0.2, %v236_v17  ;;  %v237_v28 = vadd.f32 %v505_v1, %v200_v18  ;;  %v238_v29 = vadd.f32 %v505_v1, %v201_v19  ;;  %v239_v30 = vadd.f32 %v505_v1, %v202_v22 }
  0x27   : > { %v240_v31 = vadd.f32 %v505_v1, %v203_v23  ;;  %v331_v32 = vsel %vm267_vm14, %v235_v16, %v299_v26  ;;  %v204_v34 = vmul.f32 %v495_v0, %v167_v24  ;;  %v205_v35 = vmul.f32 %v495_v0, %v168_v25 }
  0x28   : > { %v332_v33 = vsel %vm268_vm15, %v236_v17, %v300_v27  ;;  %363 = vst [vmem:[%s533_s22 + $0x70] sm:$0xff] %v331_v32  ;;  %vm269_vm0 = vcmp.gt.f32.partialorder %v237_v28, 0.0  ;;  %v301_v38 = vmul.f32 0.2, %v237_v28  ;;  %vm270_vm1 = vcmp.gt.f32.partialorder %v238_v29, 0.0 }
  0x29   : > { %364 = vst [vmem:[%s533_s22 + $0x78] sm:$0xff] %v332_v33  ;;  %v302_v39 = vmul.f32 0.2, %v238_v29  ;;  %vm271_vm2 = vcmp.gt.f32.partialorder %v239_v30, 0.0  ;;  %v303_v40 = vmul.f32 0.2, %v239_v30  ;;  %v241_v44 = vadd.f32 %v505_v1, %v204_v34 }
  0x2a   : > { %vm272_vm3 = vcmp.gt.f32.partialorder %v240_v31, 0.0  ;;  %v304_v41 = vmul.f32 0.2, %v240_v31  ;;  %v333_v42 = vsel %vm269_vm0, %v237_v28, %v301_v38  ;;  %v242_v45 = vadd.f32 %v505_v1, %v205_v35 }
  0x2b   : > { %v334_v43 = vsel %vm270_vm1, %v238_v29, %v302_v39  ;;  %365 = vst [vmem:[%s533_s22 + $0x80] sm:$0xff] %v333_v42  ;;  %v335_v48 = vsel %vm271_vm2, %v239_v30, %v303_v40  ;;  %v206_v50 = vmul.f32 %v495_v0, %v169_v36  ;;  %v207_v51 = vmul.f32 %v495_v0, %v170_v37 }
  0x2c   : > { %366 = vst [vmem:[%s533_s22 + $0x88] sm:$0xff] %v334_v43  ;;  %v336_v49 = vsel %vm272_vm3, %v240_v31, %v304_v41  ;;  %367 = vst [vmem:[%s533_s22 + $0x90] sm:$0xff] %v335_v48  ;;  %vm273_vm4 = vcmp.gt.f32.partialorder %v241_v44, 0.0  ;;  %v305_v54 = vmul.f32 0.2, %v241_v44  ;;  %vm274_vm5 = vcmp.gt.f32.partialorder %v242_v45, 0.0 }
  0x2d   : > { %368 = vst [vmem:[%s533_s22 + $0x98] sm:$0xff] %v336_v49  ;;  %v306_v55 = vmul.f32 0.2, %v242_v45  ;;  %v243_v56 = vadd.f32 %v505_v1, %v206_v50  ;;  %v244_v57 = vadd.f32 %v505_v1, %v207_v51  ;;  %v208_v58 = vmul.f32 %v495_v0, %v171_v46 }
  0x2e   : > { %v209_v59 = vmul.f32 %v495_v0, %v172_v47  ;;  %v337_v60 = vsel %vm273_vm4, %v241_v44, %v305_v54  ;;  %v210_v62 = vmul.f32 %v495_v0, %v173_v52  ;;  %v211_v63 = vmul.f32 %v495_v0, %v174_v53 }
  0x2f   : > { %v338_v61 = vsel %vm274_vm5, %v242_v45, %v306_v55  ;;  %369 = vst [vmem:[%s533_s22 + $0xa0] sm:$0xff] %v337_v60  ;;  %vm275_vm6 = vcmp.gt.f32.partialorder %v243_v56, 0.0  ;;  %v307_v4 = vmul.f32 0.2, %v243_v56  ;;  %vm276_vm7 = vcmp.gt.f32.partialorder %v244_v57, 0.0 }
  0x30   : > { %370 = vst [vmem:[%s533_s22 + $0xa8] sm:$0xff] %v338_v61  ;;  %v308_v5 = vmul.f32 0.2, %v244_v57  ;;  %v245_v6 = vadd.f32 %v505_v1, %v208_v58  ;;  %v246_v7 = vadd.f32 %v505_v1, %v209_v59  ;;  %v247_v8 = vadd.f32 %v505_v1, %v210_v62 }
  0x31   : > { %v248_v9 = vadd.f32 %v505_v1, %v211_v63  ;;  %v339_v10 = vsel %vm275_vm6, %v243_v56, %v307_v4  ;;  %v212_v12 = vmul.f32 %v495_v0, %v175_v2  ;;  %v213_v13 = vmul.f32 %v495_v0, %v176_v3 }
  0x32   : > { %v340_v11 = vsel %vm276_vm7, %v244_v57, %v308_v5  ;;  %371 = vst [vmem:[%s533_s22 + $0xb0] sm:$0xff] %v339_v10  ;;  %vm277_vm8 = vcmp.gt.f32.partialorder %v245_v6, 0.0  ;;  %v309_v16 = vmul.f32 0.2, %v245_v6  ;;  %vm278_vm9 = vcmp.gt.f32.partialorder %v246_v7, 0.0 }
  0x33   : > { %372 = vst [vmem:[%s533_s22 + $0xb8] sm:$0xff] %v340_v11  ;;  %v310_v17 = vmul.f32 0.2, %v246_v7  ;;  %vm279_vm10 = vcmp.gt.f32.partialorder %v247_v8, 0.0  ;;  %v311_v18 = vmul.f32 0.2, %v247_v8  ;;  %v249_v22 = vadd.f32 %v505_v1, %v212_v12 }
  0x34   : > { %vm280_vm11 = vcmp.gt.f32.partialorder %v248_v9, 0.0  ;;  %v312_v19 = vmul.f32 0.2, %v248_v9  ;;  %v341_v20 = vsel %vm277_vm8, %v245_v6, %v309_v16  ;;  %v250_v23 = vadd.f32 %v505_v1, %v213_v13 }
  0x35   : > { %v342_v21 = vsel %vm278_vm9, %v246_v7, %v310_v17  ;;  %373 = vst [vmem:[%s533_s22 + $0xc0] sm:$0xff] %v341_v20  ;;  %v343_v24 = vsel %vm279_vm10, %v247_v8, %v311_v18  ;;  %v214_v26 = vmul.f32 %v495_v0, %v177_v14  ;;  %v215_v27 = vmul.f32 %v495_v0, %v178_v15 }
  0x36   : > { %374 = vst [vmem:[%s533_s22 + $0xc8] sm:$0xff] %v342_v21  ;;  %v344_v25 = vsel %vm280_vm11, %v248_v9, %v312_v19  ;;  %375 = vst [vmem:[%s533_s22 + $0xd0] sm:$0xff] %v343_v24  ;;  %vm281_vm12 = vcmp.gt.f32.partialorder %v249_v22, 0.0  ;;  %v313_v28 = vmul.f32 0.2, %v249_v22  ;;  %vm282_vm13 = vcmp.gt.f32.partialorder %v250_v23, 0.0 }
  0x37   : > { %376 = vst [vmem:[%s533_s22 + $0xd8] sm:$0xff] %v344_v25  ;;  %v314_v29 = vmul.f32 0.2, %v250_v23  ;;  %v251_v30 = vadd.f32 %v505_v1, %v214_v26  ;;  %v252_v31 = vadd.f32 %v505_v1, %v215_v27 }
  0x38   : > { %v345_v32 = vsel %vm281_vm12, %v249_v22, %v313_v28 }
  0x39   : > { %v346_v33 = vsel %vm282_vm13, %v250_v23, %v314_v29  ;;  %377 = vst [vmem:[%s533_s22 + $0xe0] sm:$0xff] %v345_v32  ;;  %vm283_vm14 = vcmp.gt.f32.partialorder %v251_v30, 0.0  ;;  %v315_v34 = vmul.f32 0.2, %v251_v30  ;;  %vm284_vm15 = vcmp.gt.f32.partialorder %v252_v31, 0.0 }
  0x3a   : > { %378 = vst [vmem:[%s533_s22 + $0xe8] sm:$0xff] %v346_v33  ;;  %v316_v0 = vmul.f32 0.2, %v252_v31 }
  0x3b   : > { %v347_v35 = vsel %vm283_vm14, %v251_v30, %v315_v34 }
  0x3c   : > { %v348_v36 = vsel %vm284_vm15, %v252_v31, %v316_v0  ;;  %379 = vst [vmem:[%s533_s22 + $0xf0] sm:$0xff] %v347_v35 }
  0x3d   : > { %380 = vst [vmem:[%s533_s22 + $0xf8] sm:$0xff] %v348_v36 }
  0x3e PF: > { %s12_s9 = sadd.s32 1, %s464_s9  }
  0x3f   : > { %p9_p4 = scmp.ge.s32.totalorder %s12_s9, 4  }
  0x41   :  { %11 = sbr.rel (!%p9_p4) target bundleno = 1 (0x1), region = 58 }

// kernel: discriminator_forward.11
= control target key start
LH: loop header
LB: loop body
LE: loop exit
PB: predicated region body
PF: predicated region fallthrough
CT: control target
= control target key end

     0   :  { %vm409_vm0 = vcmask 1040384   ;;  %vm411_vm1 = vcmask 1041408   ;;  %s767_s1 = inlined_call_operand.vmem [shape: bf16[256,128], index: 1, kind: input, shape index: {}]   ;;  %s768_s0 = inlined_call_operand.vmem [shape: bf16[128,256], index: 0, kind: input, shape index: {}]   ;;  %s769_s2 = inlined_call_operand.vmem [shape: f32[128,128], index: 2, kind: output, shape index: {0}]   ;;  %s770_s3 = inlined_call_operand.vmem [shape: f32[8,128], index: 3, kind: output, shape index: {1}]  }
   0x1   :  { %v542_v0 = vld [vmem:[%s767_s1 + $0x40] sm:$0xff]   ;;  %v544_v2 = vld [vmem:[%s767_s1 + $0x48] sm:$0xff]   ;;  %v546_v4 = vld [vmem:[%s767_s1 + $0x50] sm:$0xff]  }
   0x2   :  { %v543_v1 = vld [vmem:[%s767_s1] sm:$0xff]   ;;  %461 = vmatprep.subr.bf16.mxu0 %v542_v0  ;;  %525 = vmatprep.subr.bf16.mxu1 %v542_v0  ;;  %v545_v3 = vld [vmem:[%s767_s1 + $0x8] sm:$0xff]   ;;  %v547_v5 = vld [vmem:[%s767_s1 + $0x10] sm:$0xff]  }
   0x3   :  { %462 = vmatpush3.bf16.msra.mxu0 %v543_v1  ;;  %533 = vmatpush3.bf16.msra.mxu1 %v543_v1  ;;  %v548_v6 = vld [vmem:[%s767_s1 + $0x58] sm:$0xff]   ;;  %v550_v8 = vld [vmem:[%s767_s1 + $0x60] sm:$0xff]   ;;  %v552_v10 = vld [vmem:[%s767_s1 + $0x68] sm:$0xff]  }
   0x4   :  { %463 = vmatprep.subr.bf16.mxu0 %v544_v2  ;;  %526 = vmatprep.subr.bf16.mxu1 %v544_v2  ;;  %v549_v7 = vld [vmem:[%s767_s1 + $0x18] sm:$0xff]   ;;  %v551_v9 = vld [vmem:[%s767_s1 + $0x20] sm:$0xff]   ;;  %v553_v12 = vld [vmem:[%s767_s1 + $0x28] sm:$0xff]  }
   0x5   :  { %v560_v11 = vld [vmem:[%s768_s0 + $0x4] ss:$8 sps:$4 sm:$0xff]   ;;  %v554_v14 = vld [vmem:[%s767_s1 + $0x70] sm:$0xff]   ;;  %v556_v16 = vld [vmem:[%s767_s1 + $0x78] sm:$0xff]  }
   0x6   :  { %v566_v13 = vld [vmem:[%s768_s0 + $0x44] ss:$8 sps:$4 sm:$0xff]   ;;  %270 = vmatprep.mubr.bf16.mxu0 %v560_v11  ;;  %v555_v15 = vld [vmem:[%s767_s1 + $0x30] sm:$0xff]   ;;  %v557_v17 = vld [vmem:[%s767_s1 + $0x38] sm:$0xff]  }
   0x7   :  { %464 = vmatpush3.bf16.msra.mxu0 %v545_v3  ;;  %534 = vmatpush3.bf16.msra.mxu1 %v545_v3  ;;  %v558_v18 = vld [vmem:[%s768_s0] ss:$8 sps:$4 sm:$0xff]   ;;  %v561_v20 = vld [vmem:[%s768_s0 + $0x14] ss:$8 sps:$4 sm:$0xff]   ;;  %v563_v22 = vld [vmem:[%s768_s0 + $0x10] ss:$8 sps:$4 sm:$0xff]  }
   0x8   :  { %465 = vmatprep.subr.bf16.mxu0 %v546_v4  ;;  %527 = vmatprep.subr.bf16.mxu1 %v546_v4  ;;  %v564_v19 = vld [vmem:[%s768_s0 + $0x40] ss:$8 sps:$4 sm:$0xff]   ;;  %v570_v21 = vld [vmem:[%s768_s0 + $0x54] ss:$8 sps:$4 sm:$0xff]   ;;  %v572_v23 = vld [vmem:[%s768_s0 + $0x50] ss:$8 sps:$4 sm:$0xff]  }
   0x9   :  { %302 = vmatprep.mubr.bf16.mxu1 %v566_v13  ;;  %v567_v24 = vld [vmem:[%s768_s0 + $0x24] ss:$8 sps:$4 sm:$0xff]   ;;  %v569_v26 = vld [vmem:[%s768_s0 + $0x20] ss:$8 sps:$4 sm:$0xff]   ;;  %v573_v28 = vld [vmem:[%s768_s0 + $0x34] ss:$8 sps:$4 sm:$0xff]  }
   0xa   :  { %v576_v25 = vld [vmem:[%s768_s0 + $0x64] ss:$8 sps:$4 sm:$0xff]   ;;  %v578_v27 = vld [vmem:[%s768_s0 + $0x60] ss:$8 sps:$4 sm:$0xff]   ;;  %v579_v29 = vld [vmem:[%s768_s0 + $0x74] ss:$8 sps:$4 sm:$0xff]  }
   0xb   :  { %466 = vmatpush3.bf16.msra.mxu0 %v547_v5  ;;  %535 = vmatpush3.bf16.msra.mxu1 %v547_v5  ;;  %v575_v30 = vld [vmem:[%s768_s0 + $0x30] ss:$8 sps:$4 sm:$0xff]  }
   0xc   :  { %467 = vmatprep.subr.bf16.mxu0 %v548_v6  ;;  %528 = vmatprep.subr.bf16.mxu1 %v548_v6  ;;  %v581_v31 = vld [vmem:[%s768_s0 + $0x70] ss:$8 sps:$4 sm:$0xff]  }
   0xf   :  { %468 = vmatpush3.bf16.msra.mxu0 %v549_v7  ;;  %536 = vmatpush3.bf16.msra.mxu1 %v549_v7 }
  0x10   :  { %469 = vmatprep.subr.bf16.mxu0 %v550_v8  ;;  %529 = vmatprep.subr.bf16.mxu1 %v550_v8 }
  0x13   :  { %470 = vmatpush3.bf16.msra.mxu0 %v551_v9  ;;  %537 = vmatpush3.bf16.msra.mxu1 %v551_v9 }
  0x14   :  { %471 = vmatprep.subr.bf16.mxu0 %v552_v10  ;;  %530 = vmatprep.subr.bf16.mxu1 %v552_v10 }
  0x17   :  { %472 = vmatpush3.bf16.msra.mxu0 %v553_v12  ;;  %538 = vmatpush3.bf16.msra.mxu1 %v553_v12 }
  0x18   :  { %473 = vmatprep.subr.bf16.mxu0 %v554_v14  ;;  %531 = vmatprep.subr.bf16.mxu1 %v554_v14 }
  0x1b   :  { %474 = vmatpush3.bf16.msra.mxu0 %v555_v15  ;;  %539 = vmatpush3.bf16.msra.mxu1 %v555_v15 }
  0x1c   :  { %475 = vmatprep.subr.bf16.mxu0 %v556_v16  ;;  %532 = vmatprep.subr.bf16.mxu1 %v556_v16 }
  0x1f   :  { %476 = vmatpush3.bf16.msra.mxu0 %v557_v17  ;;  %540 = vmatpush3.bf16.msra.mxu1 %v557_v17 }
  0x22   :  { %271 = vmatmul.mubr.bf16.vlgmr.msra.gmra.mrb[0].mxu0 %v558_v18  ;;  %303 = vmatmul.mubr.bf16.vlgmr.msra.gmra.mrb[0].mxu1 %v564_v19 }
  0x23   :  { %278 = vmatprep.mubr.bf16.mxu0 %v561_v20  ;;  %310 = vmatprep.mubr.bf16.mxu1 %v570_v21 }
  0x2a   :  { %279 = vmatmul.mubr.bf16.gmra.mrb[4].mxu0 %v563_v22  ;;  %311 = vmatmul.mubr.bf16.gmra.mrb[4].mxu1 %v572_v23 }
  0x2b   :  { %286 = vmatprep.mubr.bf16.mxu0 %v567_v24  ;;  %318 = vmatprep.mubr.bf16.mxu1 %v576_v25 }
  0x32   :  { %287 = vmatmul.mubr.bf16.gmra.mrb[8].mxu0 %v569_v26  ;;  %319 = vmatmul.mubr.bf16.gmra.mrb[8].mxu1 %v578_v27 }
  0x33   :  { %294 = vmatprep.mubr.bf16.mxu0 %v573_v28  ;;  %326 = vmatprep.mubr.bf16.mxu1 %v579_v29 }
  0x3a   :  { %295 = vmatmul.mubr.bf16.gmra.mrb[12].mxu0 %v575_v30  ;;  %327 = vmatmul.mubr.bf16.gmra.mrb[12].mxu1 %v581_v31 }
  0xf5   :  { %v477_v32 = vpop.f32.mrb[0].mxu0  ;;  %v501_v33 = vpop.f32.mrb[0].mxu1 }
  0xf6   :  { %v478_v34 = vpop.f32.mrb[1].mxu0  ;;  %v502_v35 = vpop.f32.mrb[1].mxu1 }
  0xf7   :  { %v479_v36 = vadd.f32 %v478_v34, %v477_v32  ;;  %v480_v37 = vpop.f32.mrb[2].mxu0  ;;  %v698_v38 = vadd.f32 %v502_v35, %v501_v33  ;;  %v504_v39 = vpop.f32.mrb[2].mxu1 }
  0xf8   :  { %v481_v40 = vpop.f32.mrb[3].mxu0  ;;  %v505_v41 = vpop.f32.mrb[3].mxu1 }
  0xf9   :  { %335 = vst [vmem:[%s769_s2] sm:$0xff] %v479_v36  ;;  %v482_v42 = vadd.f32 %v481_v40, %v480_v37  ;;  %343 = vst [vmem:[%s769_s2 + $0x40] sm:$0xff] %v698_v38  ;;  %v707_v43 = vadd.f32 %v505_v41, %v504_v39  ;;  %v372_v44 = vmul.f32 %v479_v36, %v479_v36 }
  0xfa   :  { %v380_v37 = vmul.f32 %v698_v38, %v698_v38 }
  0xfb   :  { %336 = vst [vmem:[%s769_s2 + $0x8] sm:$0xff] %v482_v42  ;;  %v351_v45 = vadd.f32 %v482_v42, %v479_v36  ;;  %v373_v46 = vmul.f32 %v482_v42, %v482_v42  ;;  %344 = vst [vmem:[%s769_s2 + $0x48] sm:$0xff] %v707_v43  ;;  %v381_v41 = vmul.f32 %v707_v43, %v707_v43 }
  0xfd   :  { %v388_v47 = vadd.f32 %v373_v46, %v372_v44  ;;  %v483_v48 = vpop.f32.mrb[4].mxu0  ;;  %v507_v49 = vpop.f32.mrb[4].mxu1 }
  0xfe   :  { %v484_v50 = vpop.f32.mrb[5].mxu0  ;;  %v508_v51 = vpop.f32.mrb[5].mxu1 }
  0xff   :  { %v485_v52 = vadd.f32 %v484_v50, %v483_v48  ;;  %v486_v53 = vpop.f32.mrb[6].mxu0  ;;  %v716_v54 = vadd.f32 %v508_v51, %v507_v49  ;;  %v510_v55 = vpop.f32.mrb[6].mxu1 }
 0x100   :  { %v487_v56 = vpop.f32.mrb[7].mxu0  ;;  %v511_v57 = vpop.f32.mrb[7].mxu1 }
 0x101   :  { %337 = vst [vmem:[%s769_s2 + $0x10] sm:$0xff] %v485_v52  ;;  %v352_v58 = vadd.f32 %v485_v52, %v351_v45  ;;  %v374_v59 = vmul.f32 %v485_v52, %v485_v52  ;;  %v488_v60 = vadd.f32 %v487_v56, %v486_v53  ;;  %345 = vst [vmem:[%s769_s2 + $0x50] sm:$0xff] %v716_v54 }
 0x102   :  { %v512_v61 = vadd.f32 %v511_v57, %v510_v55  ;;  %v382_v45 = vmul.f32 %v716_v54, %v716_v54 }
 0x103   :  { %v389_v62 = vadd.f32 %v388_v47, %v374_v59  ;;  %338 = vst [vmem:[%s769_s2 + $0x18] sm:$0xff] %v488_v60  ;;  %v353_v63 = vadd.f32 %v488_v60, %v352_v58  ;;  %v375_v0 = vmul.f32 %v488_v60, %v488_v60 }
 0x104   :  { %346 = vst [vmem:[%s769_s2 + $0x58] sm:$0xff] %v512_v61  ;;  %v383_v48 = vmul.f32 %v512_v61, %v512_v61 }
 0x105   :  { %v390_v1 = vadd.f32 %v389_v62, %v375_v0  ;;  %v489_v2 = vpop.f32.mrb[8].mxu0  ;;  %v513_v3 = vpop.f32.mrb[8].mxu1 }
 0x106   :  { %v490_v4 = vpop.f32.mrb[9].mxu0  ;;  %v514_v5 = vpop.f32.mrb[9].mxu1 }
 0x107   :  { %v491_v6 = vadd.f32 %v490_v4, %v489_v2  ;;  %v492_v7 = vpop.f32.mrb[10].mxu0  ;;  %v515_v8 = vadd.f32 %v514_v5, %v513_v3  ;;  %v516_v9 = vpop.f32.mrb[10].mxu1 }
 0x108   :  { %v493_v10 = vpop.f32.mrb[11].mxu0  ;;  %v517_v11 = vpop.f32.mrb[11].mxu1 }
 0x109   :  { %339 = vst [vmem:[%s769_s2 + $0x20] sm:$0xff] %v491_v6  ;;  %v354_v12 = vadd.f32 %v491_v6, %v353_v63  ;;  %v376_v13 = vmul.f32 %v491_v6, %v491_v6  ;;  %v494_v14 = vadd.f32 %v493_v10, %v492_v7  ;;  %347 = vst [vmem:[%s769_s2 + $0x60] sm:$0xff] %v515_v8 }
 0x10a   :  { %v518_v15 = vadd.f32 %v517_v11, %v516_v9  ;;  %v384_v52 = vmul.f32 %v515_v8, %v515_v8 }
 0x10b   :  { %v391_v16 = vadd.f32 %v390_v1, %v376_v13  ;;  %340 = vst [vmem:[%s769_s2 + $0x28] sm:$0xff] %v494_v14  ;;  %v355_v17 = vadd.f32 %v494_v14, %v354_v12  ;;  %v377_v18 = vmul.f32 %v494_v14, %v494_v14 }
 0x10c   :  { %348 = vst [vmem:[%s769_s2 + $0x68] sm:$0xff] %v518_v15  ;;  %v385_v56 = vmul.f32 %v518_v15, %v518_v15 }
 0x10d   :  { %v392_v19 = vadd.f32 %v391_v16, %v377_v18  ;;  %v495_v20 = vpop.f32.mrb[12].mxu0  ;;  %v519_v21 = vpop.f32.mrb[12].mxu1 }
 0x10e   :  { %v496_v22 = vpop.f32.mrb[13].mxu0  ;;  %v520_v23 = vpop.f32.mrb[13].mxu1 }
 0x10f   :  { %v497_v24 = vadd.f32 %v496_v22, %v495_v20  ;;  %v498_v25 = vpop.f32.mrb[14].mxu0  ;;  %v521_v26 = vadd.f32 %v520_v23, %v519_v21  ;;  %v522_v27 = vpop.f32.mrb[14].mxu1 }
 0x110   :  { %v499_v28 = vpop.f32.mrb[15].mxu0  ;;  %v523_v29 = vpop.f32.mrb[15].mxu1 }
 0x111   :  { %341 = vst [vmem:[%s769_s2 + $0x30] sm:$0xff] %v497_v24  ;;  %v356_v30 = vadd.f32 %v497_v24, %v355_v17  ;;  %v378_v31 = vmul.f32 %v497_v24, %v497_v24  ;;  %v500_v32 = vadd.f32 %v499_v28, %v498_v25  ;;  %349 = vst [vmem:[%s769_s2 + $0x70] sm:$0xff] %v521_v26 }
 0x112   :  { %v524_v33 = vadd.f32 %v523_v29, %v522_v27  ;;  %v386_v57 = vmul.f32 %v521_v26, %v521_v26 }
 0x113   :  { %v393_v34 = vadd.f32 %v392_v19, %v378_v31  ;;  %342 = vst [vmem:[%s769_s2 + $0x38] sm:$0xff] %v500_v32  ;;  %v357_v35 = vadd.f32 %v500_v32, %v356_v30  ;;  %v379_v36 = vmul.f32 %v500_v32, %v500_v32 }
 0x114   :  { %350 = vst [vmem:[%s769_s2 + $0x78] sm:$0xff] %v524_v33  ;;  %v387_v62 = vmul.f32 %v524_v33, %v524_v33 }
 0x115   :  { %v358_v39 = vadd.f32 %v698_v38, %v357_v35  ;;  %v394_v40 = vadd.f32 %v393_v34, %v379_v36 }
 0x117   :  { %v359_v42 = vadd.f32 %v707_v43, %v358_v39  ;;  %v395_v44 = vadd.f32 %v394_v40, %v380_v37 }
 0x119   :  { %v396_v46 = vadd.f32 %v395_v44, %v381_v41  ;;  %v360_v47 = vadd.f32 %v716_v54, %v359_v42 }
 0x11b   :  { %v361_v49 = vadd.f32 %v512_v61, %v360_v47  ;;  %v397_v50 = vadd.f32 %v396_v46, %v382_v45 }
 0x11d   :  { %v362_v51 = vadd.f32 %v515_v8, %v361_v49  ;;  %v398_v53 = vadd.f32 %v397_v50, %v383_v48 }
 0x11f   :  { %v399_v38 = vadd.f32 %v398_v53, %v384_v52  ;;  %v363_v55 = vadd.f32 %v518_v15, %v362_v51 }
 0x121   :  { %v400_v58 = vadd.f32 %v399_v38, %v385_v56  ;;  %v364_v59 = vadd.f32 %v521_v26, %v363_v55 }
 0x123   :  { %v401_v43 = vadd.f32 %v400_v58, %v386_v57  ;;  %v365_v60 = vadd.f32 %v524_v33, %v364_v59 }
 0x125   :  { %v366_v63 = vrot.slane %v365_v60, 4  ;;  %v402_v0 = vadd.f32 %v401_v43, %v387_v62 }
 0x127   :  { %v367_v1 = vadd.f32 %v366_v63, %v365_v60  ;;  %v403_v2 = vrot.slane %v402_v0, 4 }
 0x129   :  { %v368_v54 = vrot.slane %v367_v1, 2  ;;  %v404_v3 = vadd.f32 %v403_v2, %v402_v0 }
 0x12b   :  { %v369_v61 = vadd.f32 %v368_v54, %v367_v1  ;;  %v405_v4 = vrot.slane %v404_v3, 2 }
 0x12d   :  { %v370_v5 = vrot.slane %v369_v61, 1  ;;  %v406_v6 = vadd.f32 %v405_v4, %v404_v3 }
 0x12f   :  { %v407_v7 = vrot.slane %v406_v6, 1  ;;  %v371_v8 = vadd.f32 %v370_v5, %v369_v61 }
 0x131   :  { %v408_v9 = vadd.f32 %v407_v7, %v406_v6 }
 0x133   :  { %v410_v10 = vsel %vm409_vm0, %v371_v8, %v408_v9 }
 0x134   :  { %v412_v11 = vsel %vm411_vm1, %v410_v10, 0.0 }
 0x135   :  { %420 = vst [vmem:[%s770_s3] sm:$0xff] %v412_v11 }

// kernel: discriminator_forward.12
= control target key start
LH: loop header
LB: loop body
LE: loop exit
PB: predicated region body
PF: predicated region fallthrough
CT: control target
= control target key end

     0   :  { %s293_s0 = inlined_call_operand.vmem [shape: f32[128,128], index: 0, kind: input, shape index: {}]   ;;  %s294_s1 = inlined_call_operand.vmem [shape: f32[8,128], index: 1, kind: input, shape index: {}]   ;;  %s295_s2 = inlined_call_operand.vmem [shape: f32[128,128], index: 2, kind: output, shape index: {}]  }
   0x1   :  { %v11_v0 = vld [vmem:[%s293_s0] sm:$0xff]  ;;  %v12_v4 = vld [vmem:[%s293_s0 + $0x8] sm:$0xff]  ;;  %v13_v5 = vld [vmem:[%s293_s0 + $0x10] sm:$0xff] }
   0x2   :  { %v160_v1 = vld [vmem:[%s294_s1] ss:$0 sm:$0xff]  ;;  %v165_v2 = vld [vmem:[%s294_s1 + $0x1] ss:$0 sm:$0xff]  ;;  %v14_v6 = vld [vmem:[%s293_s0 + $0x18] sm:$0xff] }
   0x3   :  { %v32_v3 = vmul.f32 %v160_v1, %v11_v0  ;;  %v33_v7 = vmul.f32 %v160_v1, %v12_v4  ;;  %v34_v8 = vmul.f32 %v160_v1, %v13_v5  ;;  %v35_v9 = vmul.f32 %v160_v1, %v14_v6  ;;  %v15_v10 = vld [vmem:[%s293_s0 + $0x20] sm:$0xff]  ;;  %v16_v11 = vld [vmem:[%s293_s0 + $0x28] sm:$0xff]  ;;  %v17_v12 = vld [vmem:[%s293_s0 + $0x30] sm:$0xff] }
   0x4   :  { %v36_v14 = vmul.f32 %v160_v1, %v15_v10  ;;  %v37_v15 = vmul.f32 %v160_v1, %v16_v11  ;;  %v38_v16 = vmul.f32 %v160_v1, %v17_v12  ;;  %v18_v17 = vld [vmem:[%s293_s0 + $0x38] sm:$0xff]  ;;  %v19_v25 = vld [vmem:[%s293_s0 + $0x40] sm:$0xff]  ;;  %v20_v30 = vld [vmem:[%s293_s0 + $0x48] sm:$0xff] }
   0x5   :  { %v53_v13 = vadd.f32 %v165_v2, %v32_v3  ;;  %v54_v18 = vadd.f32 %v165_v2, %v33_v7  ;;  %v55_v19 = vadd.f32 %v165_v2, %v34_v8  ;;  %v56_v20 = vadd.f32 %v165_v2, %v35_v9  ;;  %v21_v31 = vld [vmem:[%s293_s0 + $0x50] sm:$0xff]  ;;  %v22_v43 = vld [vmem:[%s293_s0 + $0x58] sm:$0xff]  ;;  %v23_v44 = vld [vmem:[%s293_s0 + $0x60] sm:$0xff] }
   0x6   :  { %v39_v21 = vmul.f32 %v160_v1, %v18_v17  ;;  %v57_v23 = vadd.f32 %v165_v2, %v36_v14  ;;  %v58_v24 = vadd.f32 %v165_v2, %v37_v15  ;;  %v59_v37 = vadd.f32 %v165_v2, %v38_v16  ;;  %v24_v45 = vld [vmem:[%s293_s0 + $0x68] sm:$0xff]  ;;  %v25_v56 = vld [vmem:[%s293_s0 + $0x70] sm:$0xff]  ;;  %v26_v4 = vld [vmem:[%s293_s0 + $0x78] sm:$0xff] }
   0x7   :  { %vm69_vm0 = vcmp.gt.f32.partialorder %v53_v13, 0.0  ;;  %v85_v22 = vmul.f32 0.2, %v53_v13  ;;  %vm70_vm1 = vcmp.gt.f32.partialorder %v54_v18, 0.0  ;;  %v86_v26 = vmul.f32 0.2, %v54_v18 }
   0x8   :  { %vm71_vm2 = vcmp.gt.f32.partialorder %v55_v19, 0.0  ;;  %v87_v27 = vmul.f32 0.2, %v55_v19  ;;  %vm72_vm3 = vcmp.gt.f32.partialorder %v56_v20, 0.0  ;;  %v88_v29 = vmul.f32 0.2, %v56_v20 }
   0x9   :  { %v101_v28 = vsel %vm69_vm0, %v53_v13, %v85_v22  ;;  %vm73_vm4 = vcmp.gt.f32.partialorder %v57_v23, 0.0  ;;  %v102_v32 = vsel %vm70_vm1, %v54_v18, %v86_v26  ;;  %v89_v34 = vmul.f32 0.2, %v57_v23 }
   0xa   :  { %117 = vst [vmem:[%s295_s2] sm:$0xff] %v101_v28  ;;  %v103_v33 = vsel %vm71_vm2, %v55_v19, %v87_v27  ;;  %vm74_vm5 = vcmp.gt.f32.partialorder %v58_v24, 0.0  ;;  %118 = vst [vmem:[%s295_s2 + $0x8] sm:$0xff] %v102_v32  ;;  %v104_v35 = vsel %vm72_vm3, %v56_v20, %v88_v29  ;;  %v90_v36 = vmul.f32 0.2, %v58_v24 }
   0xb   :  { %119 = vst [vmem:[%s295_s2 + $0x10] sm:$0xff] %v103_v33  ;;  %v60_v38 = vadd.f32 %v165_v2, %v39_v21  ;;  %120 = vst [vmem:[%s295_s2 + $0x18] sm:$0xff] %v104_v35  ;;  %v105_v39 = vsel %vm73_vm4, %v57_v23, %v89_v34  ;;  %v40_v40 = vmul.f32 %v160_v1, %v19_v25  ;;  %vm75_vm6 = vcmp.gt.f32.partialorder %v59_v37, 0.0 }
   0xc   :  { %v41_v41 = vmul.f32 %v160_v1, %v20_v30  ;;  %v42_v42 = vmul.f32 %v160_v1, %v21_v31  ;;  %121 = vst [vmem:[%s295_s2 + $0x20] sm:$0xff] %v105_v39  ;;  %v106_v46 = vsel %vm74_vm5, %v58_v24, %v90_v36  ;;  %v91_v47 = vmul.f32 0.2, %v59_v37 }
   0xd   :  { %vm76_vm7 = vcmp.gt.f32.partialorder %v60_v38, 0.0  ;;  %122 = vst [vmem:[%s295_s2 + $0x28] sm:$0xff] %v106_v46  ;;  %v92_v48 = vmul.f32 0.2, %v60_v38  ;;  %v61_v49 = vadd.f32 %v165_v2, %v40_v40  ;;  %v43_v53 = vmul.f32 %v160_v1, %v22_v43 }
   0xe   :  { %v62_v50 = vadd.f32 %v165_v2, %v41_v41  ;;  %v63_v51 = vadd.f32 %v165_v2, %v42_v42  ;;  %v107_v52 = vsel %vm75_vm6, %v59_v37, %v91_v47  ;;  %v44_v54 = vmul.f32 %v160_v1, %v23_v44 }
   0xf   :  { %v45_v55 = vmul.f32 %v160_v1, %v24_v45  ;;  %123 = vst [vmem:[%s295_s2 + $0x30] sm:$0xff] %v107_v52  ;;  %v108_v57 = vsel %vm76_vm7, %v60_v38, %v92_v48  ;;  %vm77_vm8 = vcmp.gt.f32.partialorder %v61_v49, 0.0  ;;  %v93_v58 = vmul.f32 0.2, %v61_v49 }
  0x10   :  { %vm78_vm9 = vcmp.gt.f32.partialorder %v62_v50, 0.0  ;;  %124 = vst [vmem:[%s295_s2 + $0x38] sm:$0xff] %v108_v57  ;;  %v94_v59 = vmul.f32 0.2, %v62_v50  ;;  %vm79_vm10 = vcmp.gt.f32.partialorder %v63_v51, 0.0  ;;  %v64_v61 = vadd.f32 %v165_v2, %v43_v53 }
  0x11   :  { %v95_v60 = vmul.f32 0.2, %v63_v51  ;;  %v109_v62 = vsel %vm77_vm8, %v61_v49, %v93_v58  ;;  %v65_v63 = vadd.f32 %v165_v2, %v44_v54  ;;  %v66_v0 = vadd.f32 %v165_v2, %v45_v55 }
  0x12   :  { %v46_v3 = vmul.f32 %v160_v1, %v25_v56  ;;  %125 = vst [vmem:[%s295_s2 + $0x40] sm:$0xff] %v109_v62  ;;  %v110_v5 = vsel %vm78_vm9, %v62_v50, %v94_v59  ;;  %vm80_vm11 = vcmp.gt.f32.partialorder %v64_v61, 0.0  ;;  %v96_v7 = vmul.f32 0.2, %v64_v61 }
  0x13   :  { %v111_v6 = vsel %vm79_vm10, %v63_v51, %v95_v60  ;;  %126 = vst [vmem:[%s295_s2 + $0x48] sm:$0xff] %v110_v5  ;;  %vm81_vm12 = vcmp.gt.f32.partialorder %v65_v63, 0.0  ;;  %v97_v8 = vmul.f32 0.2, %v65_v63  ;;  %vm82_vm13 = vcmp.gt.f32.partialorder %v66_v0, 0.0 }
  0x14   :  { %127 = vst [vmem:[%s295_s2 + $0x50] sm:$0xff] %v111_v6  ;;  %v98_v9 = vmul.f32 0.2, %v66_v0  ;;  %v112_v10 = vsel %vm80_vm11, %v64_v61, %v96_v7  ;;  %v67_v11 = vadd.f32 %v165_v2, %v46_v3  ;;  %v47_v12 = vmul.f32 %v160_v1, %v26_v4 }
  0x15   :  { %128 = vst [vmem:[%s295_s2 + $0x58] sm:$0xff] %v112_v10  ;;  %v113_v13 = vsel %vm81_vm12, %v65_v63, %v97_v8 }
  0x16   :  { %v114_v14 = vsel %vm82_vm13, %v66_v0, %v98_v9  ;;  %129 = vst [vmem:[%s295_s2 + $0x60] sm:$0xff] %v113_v13  ;;  %vm83_vm14 = vcmp.gt.f32.partialorder %v67_v11, 0.0  ;;  %v99_v15 = vmul.f32 0.2, %v67_v11  ;;  %v68_v16 = vadd.f32 %v165_v2, %v47_v12 }
  0x17   :  { %130 = vst [vmem:[%s295_s2 + $0x68] sm:$0xff] %v114_v14 }
  0x18   :  { %v115_v17 = vsel %vm83_vm14, %v67_v11, %v99_v15  ;;  %vm84_vm15 = vcmp.gt.f32.partialorder %v68_v16, 0.0  ;;  %v100_v1 = vmul.f32 0.2, %v68_v16 }
  0x19   :  { %131 = vst [vmem:[%s295_s2 + $0x70] sm:$0xff] %v115_v17 }
  0x1a   :  { %v116_v18 = vsel %vm84_vm15, %v68_v16, %v100_v1 }
  0x1b   :  { %132 = vst [vmem:[%s295_s2 + $0x78] sm:$0xff] %v116_v18 }

// kernel: discriminator_forward.13
= control target key start
LH: loop header
LB: loop body
LE: loop exit
PB: predicated region body
PF: predicated region fallthrough
CT: control target
= control target key end

     0   :  { %vm442_vm0 = vcmask 1040384   ;;  %vm444_vm1 = vcmask 1041408   ;;  %s758_s1 = inlined_call_operand.vmem [shape: bf16[512,128], index: 1, kind: input, shape index: {}]   ;;  %s759_s0 = inlined_call_operand.vmem [shape: bf16[32,512], index: 0, kind: input, shape index: {}]   ;;  %s760_s2 = inlined_call_operand.vmem [shape: f32[32,128], index: 2, kind: output, shape index: {0}]   ;;  %s761_s3 = inlined_call_operand.vmem [shape: f32[8,128], index: 3, kind: output, shape index: {1}]  }
   0x1   :  { %v559_v0 = vld [vmem:[%s758_s1 + $0x40] sm:$0xff]   ;;  %v563_v4 = vld [vmem:[%s758_s1 + $0x48] sm:$0xff]   ;;  %v567_v8 = vld [vmem:[%s758_s1 + $0x50] sm:$0xff]  }
   0x2   :  { %v560_v1 = vld [vmem:[%s758_s1 + $0xc0] sm:$0xff]   ;;  %502 = vmatprep.subr.bf16.mxu0 %v559_v0  ;;  %v564_v5 = vld [vmem:[%s758_s1 + $0xc8] sm:$0xff]   ;;  %v568_v9 = vld [vmem:[%s758_s1 + $0xd0] sm:$0xff]  }
   0x3   :  { %v561_v2 = vld [vmem:[%s758_s1] sm:$0xff]   ;;  %530 = vmatprep.subr.bf16.mxu1 %v560_v1  ;;  %v565_v6 = vld [vmem:[%s758_s1 + $0x8] sm:$0xff]   ;;  %v569_v10 = vld [vmem:[%s758_s1 + $0x10] sm:$0xff]  }
   0x4   :  { %v562_v3 = vld [vmem:[%s758_s1 + $0x80] sm:$0xff]   ;;  %503 = vmatpush3.bf16.msra.mxu0 %v561_v2  ;;  %v566_v7 = vld [vmem:[%s758_s1 + $0x88] sm:$0xff]   ;;  %v570_v11 = vld [vmem:[%s758_s1 + $0x90] sm:$0xff]  }
   0x5   :  { %531 = vmatpush3.bf16.msra.mxu1 %v562_v3  ;;  %504 = vmatprep.subr.bf16.mxu0 %v563_v4  ;;  %v571_v12 = vld [vmem:[%s758_s1 + $0x58] sm:$0xff]   ;;  %v575_v16 = vld [vmem:[%s758_s1 + $0x60] sm:$0xff]   ;;  %v579_v20 = vld [vmem:[%s758_s1 + $0x68] sm:$0xff]  }
   0x6   :  { %532 = vmatprep.subr.bf16.mxu1 %v564_v5  ;;  %v572_v13 = vld [vmem:[%s758_s1 + $0xd8] sm:$0xff]   ;;  %v576_v17 = vld [vmem:[%s758_s1 + $0xe0] sm:$0xff]   ;;  %v580_v21 = vld [vmem:[%s758_s1 + $0xe8] sm:$0xff]  }
   0x7   :  { %v573_v14 = vld [vmem:[%s758_s1 + $0x18] sm:$0xff]   ;;  %v577_v18 = vld [vmem:[%s758_s1 + $0x20] sm:$0xff]   ;;  %v581_v22 = vld [vmem:[%s758_s1 + $0x28] sm:$0xff]  }
   0x8   :  { %505 = vmatpush3.bf16.msra.mxu0 %v565_v6  ;;  %v574_v15 = vld [vmem:[%s758_s1 + $0x98] sm:$0xff]   ;;  %v578_v19 = vld [vmem:[%s758_s1 + $0xa0] sm:$0xff]   ;;  %v582_v23 = vld [vmem:[%s758_s1 + $0xa8] sm:$0xff]  }
   0x9   :  { %533 = vmatpush3.bf16.msra.mxu1 %v566_v7  ;;  %506 = vmatprep.subr.bf16.mxu0 %v567_v8  ;;  %v583_v24 = vld [vmem:[%s758_s1 + $0x70] sm:$0xff]   ;;  %v587_v28 = vld [vmem:[%s758_s1 + $0x78] sm:$0xff]  }
   0xa   :  { %534 = vmatprep.subr.bf16.mxu1 %v568_v9  ;;  %v584_v25 = vld [vmem:[%s758_s1 + $0xf0] sm:$0xff]   ;;  %v588_v29 = vld [vmem:[%s758_s1 + $0xf8] sm:$0xff]  }
   0xb   :  { %v585_v26 = vld [vmem:[%s758_s1 + $0x30] sm:$0xff]   ;;  %v589_v30 = vld [vmem:[%s758_s1 + $0x38] sm:$0xff]  }
   0xc   :  { %507 = vmatpush3.bf16.msra.mxu0 %v569_v10  ;;  %v586_v27 = vld [vmem:[%s758_s1 + $0xb0] sm:$0xff]   ;;  %v590_v31 = vld [vmem:[%s758_s1 + $0xb8] sm:$0xff]  }
   0xd   :  { %535 = vmatpush3.bf16.msra.mxu1 %v570_v11  ;;  %508 = vmatprep.subr.bf16.mxu0 %v571_v12  ;;  %v591_v32 = vld [vmem:[%s759_s0] ss:$16 sps:$4 sm:$0xff]   ;;  %v593_v33 = vld [vmem:[%s759_s0 + $0x4] ss:$16 sps:$4 sm:$0xff]   ;;  %v594_v34 = vld [vmem:[%s759_s0 + $0x8] ss:$16 sps:$4 sm:$0xff]  }
   0xe   :  { %536 = vmatprep.subr.bf16.mxu1 %v572_v13  ;;  %v596_v35 = vld [vmem:[%s759_s0 + $0xc] ss:$16 sps:$4 sm:$0xff]   ;;  %350 = vmatprep.mubr.bf16.mxu0 %v593_v33  ;;  %v597_v36 = vld [vmem:[%s759_s0 + $0x24] ss:$16 sps:$4 sm:$0xff]   ;;  %v601_v38 = vld [vmem:[%s759_s0 + $0x20] ss:$16 sps:$4 sm:$0xff]  }
   0xf   :  { %399 = vmatprep.mubr.bf16.mxu1 %v596_v35  ;;  %v599_v37 = vld [vmem:[%s759_s0 + $0x2c] ss:$16 sps:$4 sm:$0xff]   ;;  %v602_v39 = vld [vmem:[%s759_s0 + $0x28] ss:$16 sps:$4 sm:$0xff]  }
  0x10   :  { %509 = vmatpush3.bf16.msra.mxu0 %v573_v14 }
  0x11   :  { %537 = vmatpush3.bf16.msra.mxu1 %v574_v15  ;;  %510 = vmatprep.subr.bf16.mxu0 %v575_v16 }
  0x12   :  { %538 = vmatprep.subr.bf16.mxu1 %v576_v17 }
  0x14   :  { %511 = vmatpush3.bf16.msra.mxu0 %v577_v18 }
  0x15   :  { %539 = vmatpush3.bf16.msra.mxu1 %v578_v19  ;;  %512 = vmatprep.subr.bf16.mxu0 %v579_v20 }
  0x16   :  { %540 = vmatprep.subr.bf16.mxu1 %v580_v21 }
  0x18   :  { %513 = vmatpush3.bf16.msra.mxu0 %v581_v22 }
  0x19   :  { %541 = vmatpush3.bf16.msra.mxu1 %v582_v23  ;;  %514 = vmatprep.subr.bf16.mxu0 %v583_v24 }
  0x1a   :  { %542 = vmatprep.subr.bf16.mxu1 %v584_v25 }
  0x1c   :  { %515 = vmatpush3.bf16.msra.mxu0 %v585_v26 }
  0x1d   :  { %543 = vmatpush3.bf16.msra.mxu1 %v586_v27  ;;  %516 = vmatprep.subr.bf16.mxu0 %v587_v28 }
  0x1e   :  { %544 = vmatprep.subr.bf16.mxu1 %v588_v29 }
  0x20   :  { %517 = vmatpush3.bf16.msra.mxu0 %v589_v30 }
  0x21   :  { %545 = vmatpush3.bf16.msra.mxu1 %v590_v31 }
  0x23   :  { %351 = vmatmul.mubr.bf16.vlgmr.msra.gmra.mrb[0].mxu0 %v591_v32 }
  0x24   :  { %400 = vmatmul.mubr.bf16.vlgmr.msra.gmra.mrb[0].mxu1 %v594_v34  ;;  %358 = vmatprep.mubr.bf16.mxu0 %v597_v36 }
  0x25   :  { %407 = vmatprep.mubr.bf16.mxu1 %v599_v37 }
  0x2b   :  { %359 = vmatmul.mubr.bf16.gmra.mrb[4].mxu0 %v601_v38 }
  0x2c   :  { %408 = vmatmul.mubr.bf16.gmra.mrb[4].mxu1 %v602_v39 }
  0xf6   :  { %v518_v40 = vpop.f32.mrb[0].mxu0 }
  0xf7   :  { %v546_v41 = vpop.f32.mrb[0].mxu1  ;;  %v519_v42 = vpop.f32.mrb[1].mxu0 }
  0xf8   :  { %v520_v43 = vadd.f32 %v519_v42, %v518_v40  ;;  %v547_v44 = vpop.f32.mrb[1].mxu1  ;;  %v521_v45 = vpop.f32.mrb[2].mxu0 }
  0xf9   :  { %v548_v46 = vadd.f32 %v547_v44, %v546_v41  ;;  %v549_v47 = vpop.f32.mrb[2].mxu1  ;;  %v522_v48 = vpop.f32.mrb[3].mxu0 }
  0xfa   :  { %v523_v49 = vadd.f32 %v522_v48, %v521_v45  ;;  %v550_v50 = vpop.f32.mrb[3].mxu1 }
  0xfb   :  { %v402_v51 = vadd.f32 %v548_v46, %v520_v43  ;;  %v551_v52 = vadd.f32 %v550_v50, %v549_v47 }
  0xfd   :  { %416 = vst [vmem:[%s760_s2] sm:$0xff] %v402_v51  ;;  %v405_v53 = vadd.f32 %v551_v52, %v523_v49  ;;  %v429_v55 = vmul.f32 %v402_v51, %v402_v51 }
  0xfe   :  { %v524_v54 = vpop.f32.mrb[4].mxu0 }
  0xff   :  { %417 = vst [vmem:[%s760_s2 + $0x8] sm:$0xff] %v405_v53  ;;  %v420_v56 = vadd.f32 %v405_v53, %v402_v51  ;;  %v430_v57 = vmul.f32 %v405_v53, %v405_v53  ;;  %v552_v58 = vpop.f32.mrb[4].mxu1  ;;  %v525_v59 = vpop.f32.mrb[5].mxu0 }
 0x100   :  { %v526_v60 = vadd.f32 %v525_v59, %v524_v54  ;;  %v553_v61 = vpop.f32.mrb[5].mxu1  ;;  %v527_v62 = vpop.f32.mrb[6].mxu0 }
 0x101   :  { %v433_v63 = vadd.f32 %v430_v57, %v429_v55  ;;  %v554_v0 = vadd.f32 %v553_v61, %v552_v58  ;;  %v555_v1 = vpop.f32.mrb[6].mxu1  ;;  %v528_v2 = vpop.f32.mrb[7].mxu0 }
 0x102   :  { %v529_v3 = vadd.f32 %v528_v2, %v527_v62  ;;  %v556_v4 = vpop.f32.mrb[7].mxu1 }
 0x103   :  { %v410_v5 = vadd.f32 %v554_v0, %v526_v60  ;;  %v557_v6 = vadd.f32 %v556_v4, %v555_v1 }
 0x105   :  { %418 = vst [vmem:[%s760_s2 + $0x10] sm:$0xff] %v410_v5  ;;  %v421_v7 = vadd.f32 %v420_v56, %v410_v5  ;;  %v431_v8 = vmul.f32 %v410_v5, %v410_v5  ;;  %v413_v9 = vadd.f32 %v557_v6, %v529_v3 }
 0x107   :  { %v434_v10 = vadd.f32 %v433_v63, %v431_v8  ;;  %419 = vst [vmem:[%s760_s2 + $0x18] sm:$0xff] %v413_v9  ;;  %v422_v11 = vadd.f32 %v421_v7, %v413_v9  ;;  %v432_v12 = vmul.f32 %v413_v9, %v413_v9 }
 0x109   :  { %v423_v13 = vrot.slane %v422_v11, 4  ;;  %v435_v14 = vadd.f32 %v434_v10, %v432_v12 }
 0x10b   :  { %v424_v15 = vadd.f32 %v423_v13, %v422_v11  ;;  %v436_v16 = vrot.slane %v435_v14, 4 }
 0x10d   :  { %v425_v17 = vrot.slane %v424_v15, 2  ;;  %v437_v18 = vadd.f32 %v436_v16, %v435_v14 }
 0x10f   :  { %v426_v19 = vadd.f32 %v425_v17, %v424_v15  ;;  %v438_v20 = vrot.slane %v437_v18, 2 }
 0x111   :  { %v427_v21 = vrot.slane %v426_v19, 1  ;;  %v439_v22 = vadd.f32 %v438_v20, %v437_v18 }
 0x113   :  { %v440_v23 = vrot.slane %v439_v22, 1  ;;  %v428_v24 = vadd.f32 %v427_v21, %v426_v19 }
 0x115   :  { %v441_v25 = vadd.f32 %v440_v23, %v439_v22 }
 0x117   :  { %v443_v26 = vsel %vm442_vm0, %v428_v24, %v441_v25 }
 0x118   :  { %v445_v27 = vsel %vm444_vm1, %v443_v26, 0.0 }
 0x119   :  { %453 = vst [vmem:[%s761_s3] sm:$0xff] %v445_v27 }

// kernel: discriminator_forward.14
= control target key start
LH: loop header
LB: loop body
LE: loop exit
PB: predicated region body
PF: predicated region fallthrough
CT: control target
= control target key end

     0   :  { %s100_s0 = inlined_call_operand.vmem [shape: f32[32,128], index: 0, kind: input, shape index: {}]   ;;  %s101_s1 = inlined_call_operand.vmem [shape: f32[8,128], index: 1, kind: input, shape index: {}]   ;;  %s102_s2 = inlined_call_operand.vmem [shape: f32[32,128], index: 2, kind: output, shape index: {}]  }
   0x1   :  { %v11_v0 = vld [vmem:[%s100_s0] sm:$0xff]  ;;  %v12_v4 = vld [vmem:[%s100_s0 + $0x8] sm:$0xff]  ;;  %v13_v5 = vld [vmem:[%s100_s0 + $0x10] sm:$0xff] }
   0x2   :  { %v53_v1 = vld [vmem:[%s101_s1] ss:$0 sm:$0xff]  ;;  %v54_v2 = vld [vmem:[%s101_s1 + $0x1] ss:$0 sm:$0xff]  ;;  %v14_v6 = vld [vmem:[%s100_s0 + $0x18] sm:$0xff] }
   0x3   :  { %v20_v3 = vmul.f32 %v53_v1, %v11_v0  ;;  %v21_v7 = vmul.f32 %v53_v1, %v12_v4  ;;  %v22_v8 = vmul.f32 %v53_v1, %v13_v5  ;;  %v23_v9 = vmul.f32 %v53_v1, %v14_v6 }
   0x5   :  { %v29_v10 = vadd.f32 %v54_v2, %v20_v3  ;;  %v30_v11 = vadd.f32 %v54_v2, %v21_v7  ;;  %v31_v12 = vadd.f32 %v54_v2, %v22_v8  ;;  %v32_v13 = vadd.f32 %v54_v2, %v23_v9 }
   0x7   :  { %vm33_vm0 = vcmp.gt.f32.partialorder %v29_v10, 0.0  ;;  %v37_v14 = vmul.f32 0.2, %v29_v10  ;;  %vm34_vm1 = vcmp.gt.f32.partialorder %v30_v11, 0.0  ;;  %v38_v15 = vmul.f32 0.2, %v30_v11 }
   0x8   :  { %vm35_vm2 = vcmp.gt.f32.partialorder %v31_v12, 0.0  ;;  %v39_v16 = vmul.f32 0.2, %v31_v12  ;;  %vm36_vm3 = vcmp.gt.f32.partialorder %v32_v13, 0.0  ;;  %v40_v18 = vmul.f32 0.2, %v32_v13 }
   0x9   :  { %v41_v17 = vsel %vm33_vm0, %v29_v10, %v37_v14  ;;  %v42_v19 = vsel %vm34_vm1, %v30_v11, %v38_v15 }
   0xa   :  { %45 = vst [vmem:[%s102_s2] sm:$0xff] %v41_v17  ;;  %v43_v20 = vsel %vm35_vm2, %v31_v12, %v39_v16  ;;  %46 = vst [vmem:[%s102_s2 + $0x8] sm:$0xff] %v42_v19  ;;  %v44_v21 = vsel %vm36_vm3, %v32_v13, %v40_v18 }
   0xb   :  { %47 = vst [vmem:[%s102_s2 + $0x10] sm:$0xff] %v43_v20  ;;  %48 = vst [vmem:[%s102_s2 + $0x18] sm:$0xff] %v44_v21 }

// kernel: discriminator_forward.15
= control target key start
LH: loop header
LB: loop body
LE: loop exit
PB: predicated region body
PF: predicated region fallthrough
CT: control target
= control target key end

     0   :  { %s1181_s1 = inlined_call_operand.vmem [shape: bf16[1024,128], index: 1, kind: input, shape index: {}]   ;;  %s1182_s0 = inlined_call_operand.vmem [shape: bf16[8,1024], index: 0, kind: input, shape index: {}]   ;;  %s1183_s2 = inlined_call_operand.vmem [shape: f32[8,128], index: 2, kind: output, shape index: {}]  }
   0x1   :  { %v885_v0 = vld [vmem:[%s1181_s1 + $0x40] sm:$0xff]   ;;  %v889_v4 = vld [vmem:[%s1181_s1 + $0x48] sm:$0xff]   ;;  %v893_v8 = vld [vmem:[%s1181_s1 + $0x50] sm:$0xff]  }
   0x2   :  { %v886_v1 = vld [vmem:[%s1181_s1 + $0xc0] sm:$0xff]   ;;  %797 = vmatprep.subr.bf16.mxu0 %v885_v0  ;;  %v890_v5 = vld [vmem:[%s1181_s1 + $0xc8] sm:$0xff]   ;;  %v894_v9 = vld [vmem:[%s1181_s1 + $0xd0] sm:$0xff]  }
   0x3   :  { %v887_v2 = vld [vmem:[%s1181_s1] sm:$0xff]   ;;  %819 = vmatprep.subr.bf16.mxu1 %v886_v1  ;;  %v891_v6 = vld [vmem:[%s1181_s1 + $0x8] sm:$0xff]   ;;  %v895_v10 = vld [vmem:[%s1181_s1 + $0x10] sm:$0xff]  }
   0x4   :  { %v888_v3 = vld [vmem:[%s1181_s1 + $0x80] sm:$0xff]   ;;  %798 = vmatpush3.bf16.msra.mxu0 %v887_v2  ;;  %v892_v7 = vld [vmem:[%s1181_s1 + $0x88] sm:$0xff]   ;;  %v896_v11 = vld [vmem:[%s1181_s1 + $0x90] sm:$0xff]  }
   0x5   :  { %820 = vmatpush3.bf16.msra.mxu1 %v888_v3  ;;  %799 = vmatprep.subr.bf16.mxu0 %v889_v4  ;;  %v897_v12 = vld [vmem:[%s1181_s1 + $0x58] sm:$0xff]   ;;  %v901_v16 = vld [vmem:[%s1181_s1 + $0x60] sm:$0xff]   ;;  %v905_v20 = vld [vmem:[%s1181_s1 + $0x68] sm:$0xff]  }
   0x6   :  { %821 = vmatprep.subr.bf16.mxu1 %v890_v5  ;;  %v898_v13 = vld [vmem:[%s1181_s1 + $0xd8] sm:$0xff]   ;;  %v902_v17 = vld [vmem:[%s1181_s1 + $0xe0] sm:$0xff]   ;;  %v906_v21 = vld [vmem:[%s1181_s1 + $0xe8] sm:$0xff]  }
   0x7   :  { %v899_v14 = vld [vmem:[%s1181_s1 + $0x18] sm:$0xff]   ;;  %v903_v18 = vld [vmem:[%s1181_s1 + $0x20] sm:$0xff]   ;;  %v907_v22 = vld [vmem:[%s1181_s1 + $0x28] sm:$0xff]  }
   0x8   :  { %800 = vmatpush3.bf16.msra.mxu0 %v891_v6  ;;  %v900_v15 = vld [vmem:[%s1181_s1 + $0x98] sm:$0xff]   ;;  %v904_v19 = vld [vmem:[%s1181_s1 + $0xa0] sm:$0xff]   ;;  %v908_v23 = vld [vmem:[%s1181_s1 + $0xa8] sm:$0xff]  }
   0x9   :  { %822 = vmatpush3.bf16.msra.mxu1 %v892_v7  ;;  %801 = vmatprep.subr.bf16.mxu0 %v893_v8  ;;  %v909_v24 = vld [vmem:[%s1181_s1 + $0x70] sm:$0xff]   ;;  %v913_v28 = vld [vmem:[%s1181_s1 + $0x78] sm:$0xff]   ;;  %v12_v32 = vld [vmem:[%s1182_s0] sm:$0xff] }
   0xa   :  { %823 = vmatprep.subr.bf16.mxu1 %v894_v9  ;;  %v910_v25 = vld [vmem:[%s1181_s1 + $0xf0] sm:$0xff]   ;;  %v914_v29 = vld [vmem:[%s1181_s1 + $0xf8] sm:$0xff]   ;;  %v13_v33 = vld [vmem:[%s1182_s0 + $0x8] sm:$0xff]  ;;  %v725_v34 = vcombine.low %v12_v32, %v12_v32  ;;  %v726_v35 = vcombine.high %v12_v32, %v12_v32 }
   0xb   :  { %v911_v26 = vld [vmem:[%s1181_s1 + $0x30] sm:$0xff]   ;;  %v915_v30 = vld [vmem:[%s1181_s1 + $0x38] sm:$0xff]   ;;  %v727_v36 = vcombine.low %v13_v33, %v13_v33  ;;  %v728_v37 = vcombine.high %v13_v33, %v13_v33  ;;  %v921_v38 = vld [vmem:[%s1181_s1 + $0x140] sm:$0xff]  }
   0xc   :  { %802 = vmatpush3.bf16.msra.mxu0 %v895_v10  ;;  %v912_v27 = vld [vmem:[%s1181_s1 + $0xb0] sm:$0xff]   ;;  %v916_v31 = vld [vmem:[%s1181_s1 + $0xb8] sm:$0xff]   ;;  %v922_v39 = vld [vmem:[%s1181_s1 + $0x1c0] sm:$0xff]   ;;  %588 = vmatprep.mubr.bf16.mxu0 %v726_v35 }
   0xd   :  { %824 = vmatpush3.bf16.msra.mxu1 %v896_v11  ;;  %803 = vmatprep.subr.bf16.mxu0 %v897_v12  ;;  %v923_v40 = vld [vmem:[%s1181_s1 + $0x100] sm:$0xff]   ;;  %v925_v42 = vld [vmem:[%s1181_s1 + $0x148] sm:$0xff]   ;;  %v929_v46 = vld [vmem:[%s1181_s1 + $0x150] sm:$0xff]  }
   0xe   :  { %825 = vmatprep.subr.bf16.mxu1 %v898_v13  ;;  %628 = vmatprep.mubr.bf16.mxu1 %v728_v37  ;;  %v924_v41 = vld [vmem:[%s1181_s1 + $0x180] sm:$0xff]   ;;  %v926_v43 = vld [vmem:[%s1181_s1 + $0x1c8] sm:$0xff]   ;;  %v930_v47 = vld [vmem:[%s1181_s1 + $0x1d0] sm:$0xff]  }
   0xf   :  { %v927_v44 = vld [vmem:[%s1181_s1 + $0x108] sm:$0xff]   ;;  %v931_v48 = vld [vmem:[%s1181_s1 + $0x110] sm:$0xff]   ;;  %v933_v50 = vld [vmem:[%s1181_s1 + $0x158] sm:$0xff]  }
  0x10   :  { %804 = vmatpush3.bf16.msra.mxu0 %v899_v14  ;;  %v928_v45 = vld [vmem:[%s1181_s1 + $0x188] sm:$0xff]   ;;  %v932_v49 = vld [vmem:[%s1181_s1 + $0x190] sm:$0xff]   ;;  %v934_v51 = vld [vmem:[%s1181_s1 + $0x1d8] sm:$0xff]  }
  0x11   :  { %826 = vmatpush3.bf16.msra.mxu1 %v900_v15  ;;  %805 = vmatprep.subr.bf16.mxu0 %v901_v16  ;;  %v935_v52 = vld [vmem:[%s1181_s1 + $0x118] sm:$0xff]   ;;  %v937_v54 = vld [vmem:[%s1181_s1 + $0x160] sm:$0xff]   ;;  %v941_v58 = vld [vmem:[%s1181_s1 + $0x168] sm:$0xff]  }
  0x12   :  { %827 = vmatprep.subr.bf16.mxu1 %v902_v17  ;;  %v936_v53 = vld [vmem:[%s1181_s1 + $0x198] sm:$0xff]   ;;  %v938_v55 = vld [vmem:[%s1181_s1 + $0x1e0] sm:$0xff]   ;;  %v942_v59 = vld [vmem:[%s1181_s1 + $0x1e8] sm:$0xff]  }
  0x13   :  { %v939_v56 = vld [vmem:[%s1181_s1 + $0x120] sm:$0xff]   ;;  %v943_v60 = vld [vmem:[%s1181_s1 + $0x128] sm:$0xff]   ;;  %v945_v62 = vld [vmem:[%s1181_s1 + $0x170] sm:$0xff]  }
  0x14   :  { %806 = vmatpush3.bf16.msra.mxu0 %v903_v18  ;;  %v940_v57 = vld [vmem:[%s1181_s1 + $0x1a0] sm:$0xff]   ;;  %v944_v61 = vld [vmem:[%s1181_s1 + $0x1a8] sm:$0xff]   ;;  %v946_v63 = vld [vmem:[%s1181_s1 + $0x1f0] sm:$0xff]  }
  0x15   :  { %828 = vmatpush3.bf16.msra.mxu1 %v904_v19  ;;  %807 = vmatprep.subr.bf16.mxu0 %v905_v20  ;;  %v947_v0 = vld [vmem:[%s1181_s1 + $0x130] sm:$0xff]   ;;  %v949_v2 = vld [vmem:[%s1181_s1 + $0x178] sm:$0xff]  }
  0x16   :  { %829 = vmatprep.subr.bf16.mxu1 %v906_v21  ;;  %v948_v1 = vld [vmem:[%s1181_s1 + $0x1b0] sm:$0xff]   ;;  %v950_v3 = vld [vmem:[%s1181_s1 + $0x1f8] sm:$0xff]  }
  0x17   :  { %v951_v4 = vld [vmem:[%s1181_s1 + $0x138] sm:$0xff]   ;;  %v14_v6 = vld [vmem:[%s1182_s0 + $0x10] sm:$0xff] }
  0x18   :  { %808 = vmatpush3.bf16.msra.mxu0 %v907_v22  ;;  %v952_v5 = vld [vmem:[%s1181_s1 + $0x1b8] sm:$0xff]   ;;  %v729_v7 = vcombine.low %v14_v6, %v14_v6  ;;  %v730_v8 = vcombine.high %v14_v6, %v14_v6 }
  0x19   :  { %830 = vmatpush3.bf16.msra.mxu1 %v908_v23  ;;  %809 = vmatprep.subr.bf16.mxu0 %v909_v24  ;;  %v15_v9 = vld [vmem:[%s1182_s0 + $0x18] sm:$0xff] }
  0x1a   :  { %831 = vmatprep.subr.bf16.mxu1 %v910_v25  ;;  %v731_v10 = vcombine.low %v15_v9, %v15_v9  ;;  %v732_v11 = vcombine.high %v15_v9, %v15_v9 }
  0x1c   :  { %810 = vmatpush3.bf16.msra.mxu0 %v911_v26 }
  0x1d   :  { %832 = vmatpush3.bf16.msra.mxu1 %v912_v27  ;;  %811 = vmatprep.subr.bf16.mxu0 %v913_v28 }
  0x1e   :  { %833 = vmatprep.subr.bf16.mxu1 %v914_v29 }
  0x20   :  { %812 = vmatpush3.bf16.msra.mxu0 %v915_v30 }
  0x21   :  { %834 = vmatpush3.bf16.msra.mxu1 %v916_v31  ;;  %841 = vmatprep.subr.bf16.mxu0 %v921_v38 }
  0x22   :  { %863 = vmatprep.subr.bf16.mxu1 %v922_v39 }
  0x23   :  { %589 = vmatmul.mubr.bf16.vlgmr.msra.gmra.mrb[0].mxu0 %v725_v34 }
  0x24   :  { %629 = vmatmul.mubr.bf16.vlgmr.msra.gmra.mrb[0].mxu1 %v727_v36  ;;  %842 = vmatpush3.bf16.msra.mxu0 %v923_v40 }
  0x25   :  { %864 = vmatpush3.bf16.msra.mxu1 %v924_v41  ;;  %843 = vmatprep.subr.bf16.mxu0 %v925_v42 }
  0x26   :  { %865 = vmatprep.subr.bf16.mxu1 %v926_v43  ;;  %668 = vmatprep.mubr.bf16.mxu0 %v730_v8 }
  0x27   :  { %708 = vmatprep.mubr.bf16.mxu1 %v732_v11 }
  0x28   :  { %844 = vmatpush3.bf16.msra.mxu0 %v927_v44 }
  0x29   :  { %866 = vmatpush3.bf16.msra.mxu1 %v928_v45  ;;  %845 = vmatprep.subr.bf16.mxu0 %v929_v46 }
  0x2a   :  { %867 = vmatprep.subr.bf16.mxu1 %v930_v47 }
  0x2c   :  { %846 = vmatpush3.bf16.msra.mxu0 %v931_v48 }
  0x2d   :  { %868 = vmatpush3.bf16.msra.mxu1 %v932_v49  ;;  %847 = vmatprep.subr.bf16.mxu0 %v933_v50 }
  0x2e   :  { %869 = vmatprep.subr.bf16.mxu1 %v934_v51 }
  0x30   :  { %848 = vmatpush3.bf16.msra.mxu0 %v935_v52 }
  0x31   :  { %870 = vmatpush3.bf16.msra.mxu1 %v936_v53  ;;  %849 = vmatprep.subr.bf16.mxu0 %v937_v54 }
  0x32   :  { %871 = vmatprep.subr.bf16.mxu1 %v938_v55 }
  0x34   :  { %850 = vmatpush3.bf16.msra.mxu0 %v939_v56 }
  0x35   :  { %872 = vmatpush3.bf16.msra.mxu1 %v940_v57  ;;  %851 = vmatprep.subr.bf16.mxu0 %v941_v58 }
  0x36   :  { %873 = vmatprep.subr.bf16.mxu1 %v942_v59 }
  0x38   :  { %852 = vmatpush3.bf16.msra.mxu0 %v943_v60 }
  0x39   :  { %874 = vmatpush3.bf16.msra.mxu1 %v944_v61  ;;  %853 = vmatprep.subr.bf16.mxu0 %v945_v62 }
  0x3a   :  { %875 = vmatprep.subr.bf16.mxu1 %v946_v63 }
  0x3c   :  { %854 = vmatpush3.bf16.msra.mxu0 %v947_v0 }
  0x3d   :  { %876 = vmatpush3.bf16.msra.mxu1 %v948_v1  ;;  %855 = vmatprep.subr.bf16.mxu0 %v949_v2 }
  0x3e   :  { %877 = vmatprep.subr.bf16.mxu1 %v950_v3 }
  0x40   :  { %856 = vmatpush3.bf16.msra.mxu0 %v951_v4 }
  0x41   :  { %878 = vmatpush3.bf16.msra.mxu1 %v952_v5 }
  0x43   :  { %669 = vmatmul.mubr.bf16.vlgmr.msra.gmra.mrb[4].mxu0 %v729_v7 }
  0x44   :  { %709 = vmatmul.mubr.bf16.vlgmr.msra.gmra.mrb[4].mxu1 %v731_v10 }
  0xf6   :  { %v813_v12 = vpop.f32.mrb[0].mxu0 }
  0xf7   :  { %v835_v13 = vpop.f32.mrb[0].mxu1  ;;  %v814_v14 = vpop.f32.mrb[1].mxu0 }
  0xf8   :  { %v836_v15 = vpop.f32.mrb[1].mxu1  ;;  %v815_v16 = vadd.f32 %v814_v14, %v813_v12  ;;  %v816_v18 = vpop.f32.mrb[2].mxu0 }
  0xf9   :  { %v837_v17 = vadd.f32 %v836_v15, %v835_v13  ;;  %v838_v19 = vpop.f32.mrb[2].mxu1  ;;  %v817_v20 = vpop.f32.mrb[3].mxu0 }
  0xfa   :  { %v839_v21 = vpop.f32.mrb[3].mxu1 }
  0xfb   :  { %v631_v22 = vadd.f32 %v837_v17, %v815_v16 }
 0x116   :  { %v857_v23 = vpop.f32.mrb[4].mxu0 }
 0x117   :  { %v879_v24 = vpop.f32.mrb[4].mxu1  ;;  %v858_v25 = vpop.f32.mrb[5].mxu0 }
 0x118   :  { %v880_v26 = vpop.f32.mrb[5].mxu1  ;;  %v859_v27 = vadd.f32 %v858_v25, %v857_v23  ;;  %v860_v29 = vpop.f32.mrb[6].mxu0 }
 0x119   :  { %v881_v28 = vadd.f32 %v880_v26, %v879_v24  ;;  %v882_v30 = vpop.f32.mrb[6].mxu1  ;;  %v861_v31 = vpop.f32.mrb[7].mxu0 }
 0x11a   :  { %v883_v32 = vpop.f32.mrb[7].mxu1  ;;  %v671_v33 = vadd.f32 %v859_v27, %v631_v22 }
 0x11c   :  { %v711_v34 = vadd.f32 %v881_v28, %v671_v33 }
 0x11e   :  { %v716_v35 = vmul.f32 0.5, %v711_v34 }
 0x120   :  { %957 = vtanh.f32 %v716_v35 }
 0x12a   :  { %v958_v36 = vpop.eup %957 }
 0x12b   :  { %v718_v37 = vadd.f32 1.0, %v958_v36 }
 0x12d   :  { %v719_v38 = vmul.f32 0.5, %v718_v37 }
 0x12f   :  { %720 = vst [vmem:[%s1183_s2] sm:$0xff] %v719_v38 }

</bundles_post_ra>
